<compile_context>
chip_gen: v5e
topology: v5e:2x2
jax: 0.10.0
libtpu: 0.0.40
codegen_flags: <defaults>
</compile_context>

<pallas_src>
import jax
import jax.numpy as jnp
from jax.experimental import pallas as pl
from jax.experimental.pallas import tpu as pltpu  # noqa: F401  (TPU backend)

# ----------------------------- config (small) --------------------------------
VOCAB       = 100
MAX_POS     = 16
HIDDEN      = 32            # 768 in real KoBERT, small here
N_HEADS     = 4
HEAD_DIM    = HIDDEN // N_HEADS
INTER       = 64
N_LAYERS    = 2
N_CLASSES   = 7
PAD_CLASSES = 128           # lane-dense logits slab; sliced back to 7 in JAX
BATCH       = 2
SEQ         = 8
LN_EPS      = 1e-12


def _layernorm(x, gamma, beta, eps=LN_EPS):
    mu = jnp.mean(x, axis=-1, keepdims=True)
    var = jnp.mean((x - mu) ** 2, axis=-1, keepdims=True)
    return (x - mu) * jax.lax.rsqrt(var + eps) * gamma + beta


def _mxu_dot(a, w):
    # bf16 operands for the MXU, f32 accumulation.  Weights are stored as bf16
    # (halves weight DMA bytes); activations are cast at the call site only —
    # all VPU elementwise work stays f32 (v5e has no bf16 VPU).
    return jnp.dot(a.astype(jnp.bfloat16), w, preferred_element_type=jnp.float32)


# ------------------------ fused whole-model kernel ----------------------------
def kobert_kernel(x_ref, mask_ref, embg_ref, embb_ref,
                  wqkv_ref, bqkv_ref, wo_ref, w1_ref, b1_ref, w2_ref,
                  vecs_ref, wp_ref, bp_ref, wc_ref, bc_ref,
                  out_ref):
    B, S, H, NH, HD = BATCH, SEQ, HIDDEN, N_HEADS, HEAD_DIM

    # Embedding LayerNorm (the gather itself happened in plain JAX).
    x = _layernorm(x_ref[...], embg_ref[...], embb_ref[...])      # (B*S, H) f32

    # Additive key mask, replicated to the (NH*B) folded-head batch layout.
    neg_bias = (1.0 - mask_ref[...]) * -1e4                       # (B, S)
    neg_bias_bh = jnp.concatenate([neg_bias] * NH, axis=0)        # (NH*B, S)
    scale = 1.0 / jnp.sqrt(jnp.float32(HD))

    for l in range(N_LAYERS):                    # static unroll (N_LAYERS=2)
        wqkv, bqkv = wqkv_ref[l], bqkv_ref[l]    # (H,3H) bf16, (1,3H) f32
        wo, w1, b1, w2 = wo_ref[l], w1_ref[l], b1_ref[l], w2_ref[l]
        vecs = vecs_ref[l]                       # (6, H): bo, b2, ln1g/b, ln2g/b
        bo, b2 = vecs[0:1], vecs[1:2]
        ln1g, ln1b, ln2g, ln2b = vecs[2:3], vecs[3:4], vecs[4:5], vecs[5:6]

        # --- self attention: fused QKV projection, one MXU push ---
        qkv = _mxu_dot(x, wqkv) + bqkv                            # (B*S, 3H) f32
        q = qkv[:, :H].reshape(B, S, H)
        k = qkv[:, H:2 * H].reshape(B, S, H)
        v = qkv[:, 2 * H:].reshape(B, S, H)

        # Fold heads into the batch dim -> one batched dot_general per matmul
        # (layout: index h*B + b ; avoids a 4-D transpose in Mosaic).
        qbh = jnp.concatenate([q[..., h * HD:(h + 1) * HD] for h in range(NH)], axis=0)
        kbh = jnp.concatenate([k[..., h * HD:(h + 1) * HD] for h in range(NH)], axis=0)
        vbh = jnp.concatenate([v[..., h * HD:(h + 1) * HD] for h in range(NH)], axis=0)

        s = jnp.einsum('bqd,bkd->bqk',
                       qbh.astype(jnp.bfloat16), kbh.astype(jnp.bfloat16),
                       preferred_element_type=jnp.float32) * scale
        s = s + neg_bias_bh[:, None, :]
        s = s - jnp.max(s, axis=-1, keepdims=True)
        p = jnp.exp(s)
        p = p * pl.reciprocal(jnp.sum(p, axis=-1, keepdims=True), approx=True)
        ctx_bh = jnp.einsum('bqk,bkd->bqd',
                            p.astype(jnp.bfloat16), vbh.astype(jnp.bfloat16),
                            preferred_element_type=jnp.float32)   # (NH*B, S, HD)
        ctx = jnp.concatenate([ctx_bh[h * B:(h + 1) * B] for h in range(NH)],
                              axis=-1).reshape(B * S, H)           # (B*S, H)

        attn = _mxu_dot(ctx, wo) + bo
        h1 = _layernorm(x + attn, ln1g, ln1b)

        # --- feed forward ---
        ff = _mxu_dot(h1, w1) + b1
        # TODO(synk): HF/KoBERT BERT uses exact (erf) GELU; tanh approximation here.
        ff = jax.nn.gelu(ff)
        ff = _mxu_dot(ff, w2) + b2
        x = _layernorm(h1 + ff, ln2g, ln2b)

    # --- pooler + classifier head (nn.Dropout(0.1) is identity at inference) ---
    cls = x.reshape(B, S, H)[:, 0, :]                              # [CLS] rows, (B, H)
    pooled = jnp.tanh(_mxu_dot(cls, wp_ref[...]) + bp_ref[...])
    # lane-dense (B, 128) store; padded classifier columns are zero.
    out_ref[...] = _mxu_dot(pooled, wc_ref[...]) + bc_ref[...]


# ------------------------------ parameter init --------------------------------
def init_params(key):
    def nrm(k, shape, scale=0.02, dtype=jnp.float32):
        return (scale * jax.random.normal(k, shape)).astype(dtype)

    keys = jax.random.split(key, 8 + N_LAYERS)

    wqkv, bqkv, wo, w1, b1, w2, vecs = [], [], [], [], [], [], []
    for li in range(N_LAYERS):
        lk = jax.random.split(keys[8 + li], 4)
        wqkv.append(nrm(lk[0], (HIDDEN, 3 * HIDDEN)))
        bqkv.append(jnp.zeros((1, 3 * HIDDEN), jnp.float32))
        wo.append(nrm(lk[1], (HIDDEN, HIDDEN)))
        w1.append(nrm(lk[2], (HIDDEN, INTER)))
        b1.append(jnp.zeros((1, INTER), jnp.float32))
        w2.append(nrm(lk[3], (INTER, HIDDEN)))
        vecs.append(jnp.stack([
            jnp.zeros((HIDDEN,)),   # bo
            jnp.zeros((HIDDEN,)),   # b2
            jnp.ones((HIDDEN,)),    # ln1 gamma
            jnp.zeros((HIDDEN,)),   # ln1 beta
            jnp.ones((HIDDEN,)),    # ln2 gamma
            jnp.zeros((HIDDEN,)),   # ln2 beta
        ]).astype(jnp.float32))

    cls_w = jnp.pad(nrm(keys[4], (HIDDEN, N_CLASSES)),
                    ((0, 0), (0, PAD_CLASSES - N_CLASSES)))

    return {
        "word_emb": nrm(keys[0], (VOCAB, HIDDEN)),
        "pos_emb":  nrm(keys[1], (MAX_POS, HIDDEN)),
        "type_emb": nrm(keys[2], (2, HIDDEN)),
        "emb_ln_g": jnp.ones((1, HIDDEN), jnp.float32),
        "emb_ln_b": jnp.zeros((1, HIDDEN), jnp.float32),
        # pooler (in-major layout: y = x @ W + b == torch x @ W.T + b)
        "pool_w": nrm(keys[3], (HIDDEN, HIDDEN), dtype=jnp.bfloat16),
        "pool_b": jnp.zeros((1, HIDDEN), jnp.float32),
        # classifier Linear(hidden, num_classes), padded to 128 lanes
        "cls_w": cls_w.astype(jnp.bfloat16),
        "cls_b": jnp.zeros((1, PAD_CLASSES), jnp.float32),
        # stacked per-layer weights (leading dim = layer), matmul weights bf16
        "wqkv": jnp.stack(wqkv).astype(jnp.bfloat16),
        "bqkv": jnp.stack(bqkv),
        "wo":   jnp.stack(wo).astype(jnp.bfloat16),
        "w1":   jnp.stack(w1).astype(jnp.bfloat16),
        "b1":   jnp.stack(b1),
        "w2":   jnp.stack(w2).astype(jnp.bfloat16),
        "vecs": jnp.stack(vecs),
    }


# ------------------------------ full forward ----------------------------------
def kobert_classifier_forward(params, input_ids, attention_mask):
    B, S = input_ids.shape
    # Embedding gather (plain-JAX glue); LayerNorm happens inside the kernel.
    emb = (params["word_emb"][input_ids]
           + params["pos_emb"][None, :S, :]
           + params["type_emb"][0][None, None, :])               # (B, S, H)
    x = emb.reshape(B * S, HIDDEN).astype(jnp.float32)            # fold batch->sublanes
    mask = attention_mask.astype(jnp.float32)                     # (B, S)

    logits_padded = pl.pallas_call(
        kobert_kernel,
        out_shape=jax.ShapeDtypeStruct((B, PAD_CLASSES), jnp.float32),
    )(x, mask,
      params["emb_ln_g"], params["emb_ln_b"],
      params["wqkv"], params["bqkv"], params["wo"],
      params["w1"], params["b1"], params["w2"],
      params["vecs"], params["pool_w"], params["pool_b"],
      params["cls_w"], params["cls_b"])

    return logits_padded[:, :N_CLASSES]                           # (B, num_classes)


# ----------------------------------- main --------------------------------------
if __name__ == "__main__":
    key = jax.random.PRNGKey(0)
    k_params, k_ids = jax.random.split(key)

    params = init_params(k_params)

    input_ids = jax.random.randint(k_ids, (BATCH, SEQ), 0, VOCAB, dtype=jnp.int32)
    attention_mask = jnp.ones((BATCH, SEQ), dtype=jnp.int32)
    attention_mask = attention_mask.at[1, SEQ - 2:].set(0)        # some padding

    logits = kobert_classifier_forward(params, input_ids, attention_mask)
    logits = jax.block_until_ready(logits)
    assert logits.shape == (BATCH, N_CLASSES)
    assert bool(jnp.all(jnp.isfinite(logits)))
    print("KERNEL_OK")
</pallas_src>

<mosaic_0001>
module attributes {stable_mosaic.version = 11 : i64} {
  func.func @kobert_kernel(%arg0: memref<16x32xf32, #tpu.memory_space<vmem>>, %arg1: memref<2x8xf32, #tpu.memory_space<vmem>>, %arg2: memref<1x32xf32, #tpu.memory_space<vmem>>, %arg3: memref<1x32xf32, #tpu.memory_space<vmem>>, %arg4: memref<2x32x96xbf16, #tpu.memory_space<vmem>>, %arg5: memref<2x1x96xf32, #tpu.memory_space<vmem>>, %arg6: memref<2x32x32xbf16, #tpu.memory_space<vmem>>, %arg7: memref<2x32x64xbf16, #tpu.memory_space<vmem>>, %arg8: memref<2x1x64xf32, #tpu.memory_space<vmem>>, %arg9: memref<2x64x32xbf16, #tpu.memory_space<vmem>>, %arg10: memref<2x6x32xf32, #tpu.memory_space<vmem>>, %arg11: memref<32x32xbf16, #tpu.memory_space<vmem>>, %arg12: memref<1x32xf32, #tpu.memory_space<vmem>>, %arg13: memref<32x128xbf16, #tpu.memory_space<vmem>>, %arg14: memref<1x128xf32, #tpu.memory_space<vmem>>, %arg15: memref<2x128xf32, #tpu.memory_space<vmem>>) attributes {dimension_semantics = [], scalar_prefetch = 0 : i64, scratch_operands = 0 : i64, tpu.core_type = #tpu.core_type<tc>} {
    %c0 = arith.constant 0 : index
    %c0_0 = arith.constant 0 : index
    %0 = vector.load %arg0[%c0, %c0_0] : memref<16x32xf32, #tpu.memory_space<vmem>>, vector<16x32xf32>
    %c0_1 = arith.constant 0 : index
    %c0_2 = arith.constant 0 : index
    %1 = vector.load %arg2[%c0_1, %c0_2] : memref<1x32xf32, #tpu.memory_space<vmem>>, vector<1x32xf32>
    %c0_3 = arith.constant 0 : index
    %c0_4 = arith.constant 0 : index
    %2 = vector.load %arg3[%c0_3, %c0_4] : memref<1x32xf32, #tpu.memory_space<vmem>>, vector<1x32xf32>
    %cst = arith.constant dense<0.000000e+00> : vector<16xf32>
    %3 = vector.multi_reduction <add>, %0, %cst [1] : vector<16x32xf32> to vector<16xf32>
    %4 = vector.shape_cast %3 : vector<16xf32> to vector<16x1xf32>
    %cst_5 = arith.constant 3.200000e+01 : f32
    %5 = vector.broadcast %cst_5 : f32 to vector<16x1xf32>
    %6 = arith.divf %4, %5 : vector<16x1xf32>
    %7 = vector.broadcast %6 : vector<16x1xf32> to vector<16x32xf32>
    %8 = arith.subf %0, %7 : vector<16x32xf32>
    %9 = arith.mulf %8, %8 : vector<16x32xf32>
    %cst_6 = arith.constant dense<0.000000e+00> : vector<16xf32>
    %10 = vector.multi_reduction <add>, %9, %cst_6 [1] : vector<16x32xf32> to vector<16xf32>
    %11 = vector.shape_cast %10 : vector<16xf32> to vector<16x1xf32>
    %cst_7 = arith.constant 3.200000e+01 : f32
    %12 = vector.broadcast %cst_7 : f32 to vector<16x1xf32>
    %13 = arith.divf %11, %12 : vector<16x1xf32>
    %14 = vector.broadcast %6 : vector<16x1xf32> to vector<16x32xf32>
    %15 = arith.subf %0, %14 : vector<16x32xf32>
    %cst_8 = arith.constant 9.99999996E-13 : f32
    %16 = vector.broadcast %cst_8 : f32 to vector<16x1xf32>
    %17 = arith.addf %13, %16 : vector<16x1xf32>
    %18 = math.rsqrt %17 : vector<16x1xf32>
    %19 = vector.broadcast %18 : vector<16x1xf32> to vector<16x32xf32>
    %20 = arith.mulf %15, %19 : vector<16x32xf32>
    %21 = vector.broadcast %1 : vector<1x32xf32> to vector<16x32xf32>
    %22 = arith.mulf %20, %21 : vector<16x32xf32>
    %23 = vector.broadcast %2 : vector<1x32xf32> to vector<16x32xf32>
    %24 = arith.addf %22, %23 : vector<16x32xf32>
    %c0_9 = arith.constant 0 : index
    %c0_10 = arith.constant 0 : index
    %25 = vector.load %arg1[%c0_9, %c0_10] : memref<2x8xf32, #tpu.memory_space<vmem>>, vector<2x8xf32>
    %cst_11 = arith.constant 1.000000e+00 : f32
    %26 = vector.broadcast %cst_11 : f32 to vector<2x8xf32>
    %27 = arith.subf %26, %25 : vector<2x8xf32>
    %cst_12 = arith.constant -1.000000e+04 : f32
    %28 = vector.broadcast %cst_12 : f32 to vector<2x8xf32>
    %29 = arith.mulf %27, %28 : vector<2x8xf32>
    %30 = tpu.concatenate %29, %29, %29, %29 in 0 : vector<2x8xf32>, vector<2x8xf32>, vector<2x8xf32>, vector<2x8xf32> -> vector<8x8xf32>
    %cst_13 = arith.constant 8.000000e+00 : f32
    %31 = math.sqrt %cst_13 : f32
    %cst_14 = arith.constant 1.000000e+00 : f32
    %32 = arith.divf %cst_14, %31 : f32
    %c0_15 = arith.constant 0 : index
    %c0_16 = arith.constant 0 : index
    %c0_17 = arith.constant 0 : index
    %33 = vector.load %arg4[%c0_15, %c0_16, %c0_17] : memref<2x32x96xbf16, #tpu.memory_space<vmem>>, vector<1x32x96xbf16>
    %34 = vector.shape_cast %33 : vector<1x32x96xbf16> to vector<32x96xbf16>
    %c0_18 = arith.constant 0 : index
    %c0_19 = arith.constant 0 : index
    %c0_20 = arith.constant 0 : index
    %35 = vector.load %arg5[%c0_18, %c0_19, %c0_20] : memref<2x1x96xf32, #tpu.memory_space<vmem>>, vector<1x1x96xf32>
    %36 = vector.shape_cast %35 : vector<1x1x96xf32> to vector<1x96xf32>
    %c0_21 = arith.constant 0 : index
    %c0_22 = arith.constant 0 : index
    %c0_23 = arith.constant 0 : index
    %37 = vector.load %arg6[%c0_21, %c0_22, %c0_23] : memref<2x32x32xbf16, #tpu.memory_space<vmem>>, vector<1x32x32xbf16>
    %38 = vector.shape_cast %37 : vector<1x32x32xbf16> to vector<32x32xbf16>
    %c0_24 = arith.constant 0 : index
    %c0_25 = arith.constant 0 : index
    %c0_26 = arith.constant 0 : index
    %39 = vector.load %arg7[%c0_24, %c0_25, %c0_26] : memref<2x32x64xbf16, #tpu.memory_space<vmem>>, vector<1x32x64xbf16>
    %40 = vector.shape_cast %39 : vector<1x32x64xbf16> to vector<32x64xbf16>
    %c0_27 = arith.constant 0 : index
    %c0_28 = arith.constant 0 : index
    %c0_29 = arith.constant 0 : index
    %41 = vector.load %arg8[%c0_27, %c0_28, %c0_29] : memref<2x1x64xf32, #tpu.memory_space<vmem>>, vector<1x1x64xf32>
    %42 = vector.shape_cast %41 : vector<1x1x64xf32> to vector<1x64xf32>
    %c0_30 = arith.constant 0 : index
    %c0_31 = arith.constant 0 : index
    %c0_32 = arith.constant 0 : index
    %43 = vector.load %arg9[%c0_30, %c0_31, %c0_32] : memref<2x64x32xbf16, #tpu.memory_space<vmem>>, vector<1x64x32xbf16>
    %44 = vector.shape_cast %43 : vector<1x64x32xbf16> to vector<64x32xbf16>
    %c0_33 = arith.constant 0 : index
    %c0_34 = arith.constant 0 : index
    %c0_35 = arith.constant 0 : index
    %45 = vector.load %arg10[%c0_33, %c0_34, %c0_35] : memref<2x6x32xf32, #tpu.memory_space<vmem>>, vector<1x6x32xf32>
    %46 = vector.shape_cast %45 : vector<1x6x32xf32> to vector<6x32xf32>
    %47 = vector.extract_strided_slice %46 {offsets = [0, 0], sizes = [1, 32], strides = [1, 1]} : vector<6x32xf32> to vector<1x32xf32>
    %48 = vector.extract_strided_slice %46 {offsets = [1, 0], sizes = [1, 32], strides = [1, 1]} : vector<6x32xf32> to vector<1x32xf32>
    %49 = vector.extract_strided_slice %46 {offsets = [2, 0], sizes = [1, 32], strides = [1, 1]} : vector<6x32xf32> to vector<1x32xf32>
    %50 = vector.extract_strided_slice %46 {offsets = [3, 0], sizes = [1, 32], strides = [1, 1]} : vector<6x32xf32> to vector<1x32xf32>
    %51 = vector.extract_strided_slice %46 {offsets = [4, 0], sizes = [1, 32], strides = [1, 1]} : vector<6x32xf32> to vector<1x32xf32>
    %52 = vector.extract_strided_slice %46 {offsets = [5, 0], sizes = [1, 32], strides = [1, 1]} : vector<6x32xf32> to vector<1x32xf32>
    %53 = arith.truncf %24 : vector<16x32xf32> to vector<16x32xbf16>
    %cst_36 = arith.constant dense<0.000000e+00> : vector<16x96xf32>
    %54 = tpu.matmul %53, %34, %cst_36 {dimension_numbers = #tpu.dot_dimension_numbers<[1], [0], [0], [1], [0, 0, 1, 1], [], []>} : vector<16x32xbf16>, vector<32x96xbf16>, vector<16x96xf32> -> vector<16x96xf32>
    %55 = vector.broadcast %36 : vector<1x96xf32> to vector<16x96xf32>
    %56 = arith.addf %54, %55 : vector<16x96xf32>
    %57 = vector.extract_strided_slice %56 {offsets = [0, 0], sizes = [16, 32], strides = [1, 1]} : vector<16x96xf32> to vector<16x32xf32>
    %58 = vector.shape_cast %57 : vector<16x32xf32> to vector<2x8x32xf32>
    %59 = vector.extract_strided_slice %56 {offsets = [0, 32], sizes = [16, 32], strides = [1, 1]} : vector<16x96xf32> to vector<16x32xf32>
    %60 = vector.shape_cast %59 : vector<16x32xf32> to vector<2x8x32xf32>
    %61 = vector.extract_strided_slice %56 {offsets = [0, 64], sizes = [16, 32], strides = [1, 1]} : vector<16x96xf32> to vector<16x32xf32>
    %62 = vector.shape_cast %61 : vector<16x32xf32> to vector<2x8x32xf32>
    %63 = vector.extract_strided_slice %58 {offsets = [0, 0, 0], sizes = [2, 8, 8], strides = [1, 1, 1]} : vector<2x8x32xf32> to vector<2x8x8xf32>
    %64 = vector.extract_strided_slice %58 {offsets = [0, 0, 8], sizes = [2, 8, 8], strides = [1, 1, 1]} : vector<2x8x32xf32> to vector<2x8x8xf32>
    %65 = vector.extract_strided_slice %58 {offsets = [0, 0, 16], sizes = [2, 8, 8], strides = [1, 1, 1]} : vector<2x8x32xf32> to vector<2x8x8xf32>
    %66 = vector.extract_strided_slice %58 {offsets = [0, 0, 24], sizes = [2, 8, 8], strides = [1, 1, 1]} : vector<2x8x32xf32> to vector<2x8x8xf32>
    %67 = tpu.concatenate %63, %64, %65, %66 in 0 : vector<2x8x8xf32>, vector<2x8x8xf32>, vector<2x8x8xf32>, vector<2x8x8xf32> -> vector<8x8x8xf32>
    %68 = vector.extract_strided_slice %60 {offsets = [0, 0, 0], sizes = [2, 8, 8], strides = [1, 1, 1]} : vector<2x8x32xf32> to vector<2x8x8xf32>
    %69 = vector.extract_strided_slice %60 {offsets = [0, 0, 8], sizes = [2, 8, 8], strides = [1, 1, 1]} : vector<2x8x32xf32> to vector<2x8x8xf32>
    %70 = vector.extract_strided_slice %60 {offsets = [0, 0, 16], sizes = [2, 8, 8], strides = [1, 1, 1]} : vector<2x8x32xf32> to vector<2x8x8xf32>
    %71 = vector.extract_strided_slice %60 {offsets = [0, 0, 24], sizes = [2, 8, 8], strides = [1, 1, 1]} : vector<2x8x32xf32> to vector<2x8x8xf32>
    %72 = tpu.concatenate %68, %69, %70, %71 in 0 : vector<2x8x8xf32>, vector<2x8x8xf32>, vector<2x8x8xf32>, vector<2x8x8xf32> -> vector<8x8x8xf32>
    %73 = vector.extract_strided_slice %62 {offsets = [0, 0, 0], sizes = [2, 8, 8], strides = [1, 1, 1]} : vector<2x8x32xf32> to vector<2x8x8xf32>
    %74 = vector.extract_strided_slice %62 {offsets = [0, 0, 8], sizes = [2, 8, 8], strides = [1, 1, 1]} : vector<2x8x32xf32> to vector<2x8x8xf32>
    %75 = vector.extract_strided_slice %62 {offsets = [0, 0, 16], sizes = [2, 8, 8], strides = [1, 1, 1]} : vector<2x8x32xf32> to vector<2x8x8xf32>
    %76 = vector.extract_strided_slice %62 {offsets = [0, 0, 24], sizes = [2, 8, 8], strides = [1, 1, 1]} : vector<2x8x32xf32> to vector<2x8x8xf32>
    %77 = tpu.concatenate %73, %74, %75, %76 in 0 : vector<2x8x8xf32>, vector<2x8x8xf32>, vector<2x8x8xf32>, vector<2x8x8xf32> -> vector<8x8x8xf32>
    %78 = arith.truncf %67 : vector<8x8x8xf32> to vector<8x8x8xbf16>
    %79 = arith.truncf %72 : vector<8x8x8xf32> to vector<8x8x8xbf16>
    "tpu.trace_start"() <{level = 10 : i32, message = "bqd,bkd->bqk"}> : () -> ()
    %cst_37 = arith.constant dense<0.000000e+00> : vector<8x8x8xf32>
    %80 = tpu.matmul %78, %79, %cst_37 {dimension_numbers = #tpu.dot_dimension_numbers<[2], [2], [1], [1], [0, 0, 0, 1, 1, 1], [0], [0]>} : vector<8x8x8xbf16>, vector<8x8x8xbf16>, vector<8x8x8xf32> -> vector<8x8x8xf32>
    "tpu.trace_stop"() : () -> ()
    %81 = vector.broadcast %32 : f32 to vector<8x8x8xf32>
    %82 = arith.mulf %80, %81 : vector<8x8x8xf32>
    %83 = vector.shape_cast %30 : vector<8x8xf32> to vector<8x1x8xf32>
    %84 = vector.broadcast %83 : vector<8x1x8xf32> to vector<8x8x8xf32>
    %85 = arith.addf %82, %84 : vector<8x8x8xf32>
    %cst_38 = arith.constant dense<0xFF800000> : vector<8x8xf32>
    %86 = vector.multi_reduction <maximumf>, %85, %cst_38 [2] : vector<8x8x8xf32> to vector<8x8xf32>
    %87 = vector.shape_cast %86 : vector<8x8xf32> to vector<8x8x1xf32>
    %88 = vector.broadcast %87 : vector<8x8x1xf32> to vector<8x8x8xf32>
    %89 = arith.subf %85, %88 : vector<8x8x8xf32>
    %90 = math.exp %89 : vector<8x8x8xf32>
    %cst_39 = arith.constant dense<0.000000e+00> : vector<8x8xf32>
    %91 = vector.multi_reduction <add>, %90, %cst_39 [2] : vector<8x8x8xf32> to vector<8x8xf32>
    %92 = vector.shape_cast %91 : vector<8x8xf32> to vector<8x8x1xf32>
    %93 = tpu.reciprocal %92 {approx = true} : vector<8x8x1xf32> -> vector<8x8x1xf32>
    %94 = vector.broadcast %93 : vector<8x8x1xf32> to vector<8x8x8xf32>
    %95 = arith.mulf %90, %94 : vector<8x8x8xf32>
    %96 = arith.truncf %95 : vector<8x8x8xf32> to vector<8x8x8xbf16>
    %97 = arith.truncf %77 : vector<8x8x8xf32> to vector<8x8x8xbf16>
    "tpu.trace_start"() <{level = 10 : i32, message = "bqk,bkd->bqd"}> : () -> ()
    %cst_40 = arith.constant dense<0.000000e+00> : vector<8x8x8xf32>
    %98 = tpu.matmul %96, %97, %cst_40 {dimension_numbers = #tpu.dot_dimension_numbers<[2], [1], [1], [2], [0, 0, 0, 1, 1, 2], [0], [0]>} : vector<8x8x8xbf16>, vector<8x8x8xbf16>, vector<8x8x8xf32> -> vector<8x8x8xf32>
    "tpu.trace_stop"() : () -> ()
    %99 = vector.extract_strided_slice %98 {offsets = [0, 0, 0], sizes = [2, 8, 8], strides = [1, 1, 1]} : vector<8x8x8xf32> to vector<2x8x8xf32>
    %100 = vector.extract_strided_slice %98 {offsets = [2, 0, 0], sizes = [2, 8, 8], strides = [1, 1, 1]} : vector<8x8x8xf32> to vector<2x8x8xf32>
    %101 = vector.extract_strided_slice %98 {offsets = [4, 0, 0], sizes = [2, 8, 8], strides = [1, 1, 1]} : vector<8x8x8xf32> to vector<2x8x8xf32>
    %102 = vector.extract_strided_slice %98 {offsets = [6, 0, 0], sizes = [2, 8, 8], strides = [1, 1, 1]} : vector<8x8x8xf32> to vector<2x8x8xf32>
    %103 = tpu.concatenate %99, %100, %101, %102 in 2 : vector<2x8x8xf32>, vector<2x8x8xf32>, vector<2x8x8xf32>, vector<2x8x8xf32> -> vector<2x8x32xf32>
    %104 = vector.shape_cast %103 : vector<2x8x32xf32> to vector<16x32xf32>
    %105 = arith.truncf %104 : vector<16x32xf32> to vector<16x32xbf16>
    %cst_41 = arith.constant dense<0.000000e+00> : vector<16x32xf32>
    %106 = tpu.matmul %105, %38, %cst_41 {dimension_numbers = #tpu.dot_dimension_numbers<[1], [0], [0], [1], [0, 0, 1, 1], [], []>} : vector<16x32xbf16>, vector<32x32xbf16>, vector<16x32xf32> -> vector<16x32xf32>
    %107 = vector.broadcast %47 : vector<1x32xf32> to vector<16x32xf32>
    %108 = arith.addf %106, %107 : vector<16x32xf32>
    %109 = arith.addf %24, %108 : vector<16x32xf32>
    %cst_42 = arith.constant dense<0.000000e+00> : vector<16xf32>
    %110 = vector.multi_reduction <add>, %109, %cst_42 [1] : vector<16x32xf32> to vector<16xf32>
    %111 = vector.shape_cast %110 : vector<16xf32> to vector<16x1xf32>
    %cst_43 = arith.constant 3.200000e+01 : f32
    %112 = vector.broadcast %cst_43 : f32 to vector<16x1xf32>
    %113 = arith.divf %111, %112 : vector<16x1xf32>
    %114 = vector.broadcast %113 : vector<16x1xf32> to vector<16x32xf32>
    %115 = arith.subf %109, %114 : vector<16x32xf32>
    %116 = arith.mulf %115, %115 : vector<16x32xf32>
    %cst_44 = arith.constant dense<0.000000e+00> : vector<16xf32>
    %117 = vector.multi_reduction <add>, %116, %cst_44 [1] : vector<16x32xf32> to vector<16xf32>
    %118 = vector.shape_cast %117 : vector<16xf32> to vector<16x1xf32>
    %cst_45 = arith.constant 3.200000e+01 : f32
    %119 = vector.broadcast %cst_45 : f32 to vector<16x1xf32>
    %120 = arith.divf %118, %119 : vector<16x1xf32>
    %121 = vector.broadcast %113 : vector<16x1xf32> to vector<16x32xf32>
    %122 = arith.subf %109, %121 : vector<16x32xf32>
    %cst_46 = arith.constant 9.99999996E-13 : f32
    %123 = vector.broadcast %cst_46 : f32 to vector<16x1xf32>
    %124 = arith.addf %120, %123 : vector<16x1xf32>
    %125 = math.rsqrt %124 : vector<16x1xf32>
    %126 = vector.broadcast %125 : vector<16x1xf32> to vector<16x32xf32>
    %127 = arith.mulf %122, %126 : vector<16x32xf32>
    %128 = vector.broadcast %49 : vector<1x32xf32> to vector<16x32xf32>
    %129 = arith.mulf %127, %128 : vector<16x32xf32>
    %130 = vector.broadcast %50 : vector<1x32xf32> to vector<16x32xf32>
    %131 = arith.addf %129, %130 : vector<16x32xf32>
    %132 = arith.truncf %131 : vector<16x32xf32> to vector<16x32xbf16>
    %cst_47 = arith.constant dense<0.000000e+00> : vector<16x64xf32>
    %133 = tpu.matmul %132, %40, %cst_47 {dimension_numbers = #tpu.dot_dimension_numbers<[1], [0], [0], [1], [0, 0, 1, 1], [], []>} : vector<16x32xbf16>, vector<32x64xbf16>, vector<16x64xf32> -> vector<16x64xf32>
    %134 = vector.broadcast %42 : vector<1x64xf32> to vector<16x64xf32>
    %135 = arith.addf %133, %134 : vector<16x64xf32>
    %136 = arith.mulf %135, %135 : vector<16x64xf32>
    %137 = arith.mulf %135, %136 : vector<16x64xf32>
    %cst_48 = arith.constant 4.471500e-02 : f32
    %138 = vector.broadcast %cst_48 : f32 to vector<16x64xf32>
    %139 = arith.mulf %138, %137 : vector<16x64xf32>
    %140 = arith.addf %135, %139 : vector<16x64xf32>
    %cst_49 = arith.constant 0.797884583 : f32
    %141 = vector.broadcast %cst_49 : f32 to vector<16x64xf32>
    %142 = arith.mulf %141, %140 : vector<16x64xf32>
    %143 = math.tanh %142 : vector<16x64xf32>
    %cst_50 = arith.constant 1.000000e+00 : f32
    %144 = vector.broadcast %cst_50 : f32 to vector<16x64xf32>
    %145 = arith.addf %144, %143 : vector<16x64xf32>
    %cst_51 = arith.constant 5.000000e-01 : f32
    %146 = vector.broadcast %cst_51 : f32 to vector<16x64xf32>
    %147 = arith.mulf %146, %145 : vector<16x64xf32>
    %148 = arith.mulf %135, %147 : vector<16x64xf32>
    %149 = arith.truncf %148 : vector<16x64xf32> to vector<16x64xbf16>
    %cst_52 = arith.constant dense<0.000000e+00> : vector<16x32xf32>
    %150 = tpu.matmul %149, %44, %cst_52 {dimension_numbers = #tpu.dot_dimension_numbers<[1], [0], [0], [1], [0, 0, 1, 1], [], []>} : vector<16x64xbf16>, vector<64x32xbf16>, vector<16x32xf32> -> vector<16x32xf32>
    %151 = vector.broadcast %48 : vector<1x32xf32> to vector<16x32xf32>
    %152 = arith.addf %150, %151 : vector<16x32xf32>
    %153 = arith.addf %131, %152 : vector<16x32xf32>
    %cst_53 = arith.constant dense<0.000000e+00> : vector<16xf32>
    %154 = vector.multi_reduction <add>, %153, %cst_53 [1] : vector<16x32xf32> to vector<16xf32>
    %155 = vector.shape_cast %154 : vector<16xf32> to vector<16x1xf32>
    %cst_54 = arith.constant 3.200000e+01 : f32
    %156 = vector.broadcast %cst_54 : f32 to vector<16x1xf32>
    %157 = arith.divf %155, %156 : vector<16x1xf32>
    %158 = vector.broadcast %157 : vector<16x1xf32> to vector<16x32xf32>
    %159 = arith.subf %153, %158 : vector<16x32xf32>
    %160 = arith.mulf %159, %159 : vector<16x32xf32>
    %cst_55 = arith.constant dense<0.000000e+00> : vector<16xf32>
    %161 = vector.multi_reduction <add>, %160, %cst_55 [1] : vector<16x32xf32> to vector<16xf32>
    %162 = vector.shape_cast %161 : vector<16xf32> to vector<16x1xf32>
    %cst_56 = arith.constant 3.200000e+01 : f32
    %163 = vector.broadcast %cst_56 : f32 to vector<16x1xf32>
    %164 = arith.divf %162, %163 : vector<16x1xf32>
    %165 = vector.broadcast %157 : vector<16x1xf32> to vector<16x32xf32>
    %166 = arith.subf %153, %165 : vector<16x32xf32>
    %cst_57 = arith.constant 9.99999996E-13 : f32
    %167 = vector.broadcast %cst_57 : f32 to vector<16x1xf32>
    %168 = arith.addf %164, %167 : vector<16x1xf32>
    %169 = math.rsqrt %168 : vector<16x1xf32>
    %170 = vector.broadcast %169 : vector<16x1xf32> to vector<16x32xf32>
    %171 = arith.mulf %166, %170 : vector<16x32xf32>
    %172 = vector.broadcast %51 : vector<1x32xf32> to vector<16x32xf32>
    %173 = arith.mulf %171, %172 : vector<16x32xf32>
    %174 = vector.broadcast %52 : vector<1x32xf32> to vector<16x32xf32>
    %175 = arith.addf %173, %174 : vector<16x32xf32>
    %c1 = arith.constant 1 : index
    %c0_58 = arith.constant 0 : index
    %c0_59 = arith.constant 0 : index
    %176 = vector.load %arg4[%c1, %c0_58, %c0_59] : memref<2x32x96xbf16, #tpu.memory_space<vmem>>, vector<1x32x96xbf16>
    %177 = vector.shape_cast %176 : vector<1x32x96xbf16> to vector<32x96xbf16>
    %c1_60 = arith.constant 1 : index
    %c0_61 = arith.constant 0 : index
    %c0_62 = arith.constant 0 : index
    %178 = vector.load %arg5[%c1_60, %c0_61, %c0_62] : memref<2x1x96xf32, #tpu.memory_space<vmem>>, vector<1x1x96xf32>
    %179 = vector.shape_cast %178 : vector<1x1x96xf32> to vector<1x96xf32>
    %c1_63 = arith.constant 1 : index
    %c0_64 = arith.constant 0 : index
    %c0_65 = arith.constant 0 : index
    %180 = vector.load %arg6[%c1_63, %c0_64, %c0_65] : memref<2x32x32xbf16, #tpu.memory_space<vmem>>, vector<1x32x32xbf16>
    %181 = vector.shape_cast %180 : vector<1x32x32xbf16> to vector<32x32xbf16>
    %c1_66 = arith.constant 1 : index
    %c0_67 = arith.constant 0 : index
    %c0_68 = arith.constant 0 : index
    %182 = vector.load %arg7[%c1_66, %c0_67, %c0_68] : memref<2x32x64xbf16, #tpu.memory_space<vmem>>, vector<1x32x64xbf16>
    %183 = vector.shape_cast %182 : vector<1x32x64xbf16> to vector<32x64xbf16>
    %c1_69 = arith.constant 1 : index
    %c0_70 = arith.constant 0 : index
    %c0_71 = arith.constant 0 : index
    %184 = vector.load %arg8[%c1_69, %c0_70, %c0_71] : memref<2x1x64xf32, #tpu.memory_space<vmem>>, vector<1x1x64xf32>
    %185 = vector.shape_cast %184 : vector<1x1x64xf32> to vector<1x64xf32>
    %c1_72 = arith.constant 1 : index
    %c0_73 = arith.constant 0 : index
    %c0_74 = arith.constant 0 : index
    %186 = vector.load %arg9[%c1_72, %c0_73, %c0_74] : memref<2x64x32xbf16, #tpu.memory_space<vmem>>, vector<1x64x32xbf16>
    %187 = vector.shape_cast %186 : vector<1x64x32xbf16> to vector<64x32xbf16>
    %c1_75 = arith.constant 1 : index
    %c0_76 = arith.constant 0 : index
    %c0_77 = arith.constant 0 : index
    %188 = vector.load %arg10[%c1_75, %c0_76, %c0_77] : memref<2x6x32xf32, #tpu.memory_space<vmem>>, vector<1x6x32xf32>
    %189 = vector.shape_cast %188 : vector<1x6x32xf32> to vector<6x32xf32>
    %190 = vector.extract_strided_slice %189 {offsets = [0, 0], sizes = [1, 32], strides = [1, 1]} : vector<6x32xf32> to vector<1x32xf32>
    %191 = vector.extract_strided_slice %189 {offsets = [1, 0], sizes = [1, 32], strides = [1, 1]} : vector<6x32xf32> to vector<1x32xf32>
    %192 = vector.extract_strided_slice %189 {offsets = [2, 0], sizes = [1, 32], strides = [1, 1]} : vector<6x32xf32> to vector<1x32xf32>
    %193 = vector.extract_strided_slice %189 {offsets = [3, 0], sizes = [1, 32], strides = [1, 1]} : vector<6x32xf32> to vector<1x32xf32>
    %194 = vector.extract_strided_slice %189 {offsets = [4, 0], sizes = [1, 32], strides = [1, 1]} : vector<6x32xf32> to vector<1x32xf32>
    %195 = vector.extract_strided_slice %189 {offsets = [5, 0], sizes = [1, 32], strides = [1, 1]} : vector<6x32xf32> to vector<1x32xf32>
    %196 = arith.truncf %175 : vector<16x32xf32> to vector<16x32xbf16>
    %cst_78 = arith.constant dense<0.000000e+00> : vector<16x96xf32>
    %197 = tpu.matmul %196, %177, %cst_78 {dimension_numbers = #tpu.dot_dimension_numbers<[1], [0], [0], [1], [0, 0, 1, 1], [], []>} : vector<16x32xbf16>, vector<32x96xbf16>, vector<16x96xf32> -> vector<16x96xf32>
    %198 = vector.broadcast %179 : vector<1x96xf32> to vector<16x96xf32>
    %199 = arith.addf %197, %198 : vector<16x96xf32>
    %200 = vector.extract_strided_slice %199 {offsets = [0, 0], sizes = [16, 32], strides = [1, 1]} : vector<16x96xf32> to vector<16x32xf32>
    %201 = vector.shape_cast %200 : vector<16x32xf32> to vector<2x8x32xf32>
    %202 = vector.extract_strided_slice %199 {offsets = [0, 32], sizes = [16, 32], strides = [1, 1]} : vector<16x96xf32> to vector<16x32xf32>
    %203 = vector.shape_cast %202 : vector<16x32xf32> to vector<2x8x32xf32>
    %204 = vector.extract_strided_slice %199 {offsets = [0, 64], sizes = [16, 32], strides = [1, 1]} : vector<16x96xf32> to vector<16x32xf32>
    %205 = vector.shape_cast %204 : vector<16x32xf32> to vector<2x8x32xf32>
    %206 = vector.extract_strided_slice %201 {offsets = [0, 0, 0], sizes = [2, 8, 8], strides = [1, 1, 1]} : vector<2x8x32xf32> to vector<2x8x8xf32>
    %207 = vector.extract_strided_slice %201 {offsets = [0, 0, 8], sizes = [2, 8, 8], strides = [1, 1, 1]} : vector<2x8x32xf32> to vector<2x8x8xf32>
    %208 = vector.extract_strided_slice %201 {offsets = [0, 0, 16], sizes = [2, 8, 8], strides = [1, 1, 1]} : vector<2x8x32xf32> to vector<2x8x8xf32>
    %209 = vector.extract_strided_slice %201 {offsets = [0, 0, 24], sizes = [2, 8, 8], strides = [1, 1, 1]} : vector<2x8x32xf32> to vector<2x8x8xf32>
    %210 = tpu.concatenate %206, %207, %208, %209 in 0 : vector<2x8x8xf32>, vector<2x8x8xf32>, vector<2x8x8xf32>, vector<2x8x8xf32> -> vector<8x8x8xf32>
    %211 = vector.extract_strided_slice %203 {offsets = [0, 0, 0], sizes = [2, 8, 8], strides = [1, 1, 1]} : vector<2x8x32xf32> to vector<2x8x8xf32>
    %212 = vector.extract_strided_slice %203 {offsets = [0, 0, 8], sizes = [2, 8, 8], strides = [1, 1, 1]} : vector<2x8x32xf32> to vector<2x8x8xf32>
    %213 = vector.extract_strided_slice %203 {offsets = [0, 0, 16], sizes = [2, 8, 8], strides = [1, 1, 1]} : vector<2x8x32xf32> to vector<2x8x8xf32>
    %214 = vector.extract_strided_slice %203 {offsets = [0, 0, 24], sizes = [2, 8, 8], strides = [1, 1, 1]} : vector<2x8x32xf32> to vector<2x8x8xf32>
    %215 = tpu.concatenate %211, %212, %213, %214 in 0 : vector<2x8x8xf32>, vector<2x8x8xf32>, vector<2x8x8xf32>, vector<2x8x8xf32> -> vector<8x8x8xf32>
    %216 = vector.extract_strided_slice %205 {offsets = [0, 0, 0], sizes = [2, 8, 8], strides = [1, 1, 1]} : vector<2x8x32xf32> to vector<2x8x8xf32>
    %217 = vector.extract_strided_slice %205 {offsets = [0, 0, 8], sizes = [2, 8, 8], strides = [1, 1, 1]} : vector<2x8x32xf32> to vector<2x8x8xf32>
    %218 = vector.extract_strided_slice %205 {offsets = [0, 0, 16], sizes = [2, 8, 8], strides = [1, 1, 1]} : vector<2x8x32xf32> to vector<2x8x8xf32>
    %219 = vector.extract_strided_slice %205 {offsets = [0, 0, 24], sizes = [2, 8, 8], strides = [1, 1, 1]} : vector<2x8x32xf32> to vector<2x8x8xf32>
    %220 = tpu.concatenate %216, %217, %218, %219 in 0 : vector<2x8x8xf32>, vector<2x8x8xf32>, vector<2x8x8xf32>, vector<2x8x8xf32> -> vector<8x8x8xf32>
    %221 = arith.truncf %210 : vector<8x8x8xf32> to vector<8x8x8xbf16>
    %222 = arith.truncf %215 : vector<8x8x8xf32> to vector<8x8x8xbf16>
    "tpu.trace_start"() <{level = 10 : i32, message = "bqd,bkd->bqk"}> : () -> ()
    %cst_79 = arith.constant dense<0.000000e+00> : vector<8x8x8xf32>
    %223 = tpu.matmul %221, %222, %cst_79 {dimension_numbers = #tpu.dot_dimension_numbers<[2], [2], [1], [1], [0, 0, 0, 1, 1, 1], [0], [0]>} : vector<8x8x8xbf16>, vector<8x8x8xbf16>, vector<8x8x8xf32> -> vector<8x8x8xf32>
    "tpu.trace_stop"() : () -> ()
    %224 = vector.broadcast %32 : f32 to vector<8x8x8xf32>
    %225 = arith.mulf %223, %224 : vector<8x8x8xf32>
    %226 = vector.shape_cast %30 : vector<8x8xf32> to vector<8x1x8xf32>
    %227 = vector.broadcast %226 : vector<8x1x8xf32> to vector<8x8x8xf32>
    %228 = arith.addf %225, %227 : vector<8x8x8xf32>
    %cst_80 = arith.constant dense<0xFF800000> : vector<8x8xf32>
    %229 = vector.multi_reduction <maximumf>, %228, %cst_80 [2] : vector<8x8x8xf32> to vector<8x8xf32>
    %230 = vector.shape_cast %229 : vector<8x8xf32> to vector<8x8x1xf32>
    %231 = vector.broadcast %230 : vector<8x8x1xf32> to vector<8x8x8xf32>
    %232 = arith.subf %228, %231 : vector<8x8x8xf32>
    %233 = math.exp %232 : vector<8x8x8xf32>
    %cst_81 = arith.constant dense<0.000000e+00> : vector<8x8xf32>
    %234 = vector.multi_reduction <add>, %233, %cst_81 [2] : vector<8x8x8xf32> to vector<8x8xf32>
    %235 = vector.shape_cast %234 : vector<8x8xf32> to vector<8x8x1xf32>
    %236 = tpu.reciprocal %235 {approx = true} : vector<8x8x1xf32> -> vector<8x8x1xf32>
    %237 = vector.broadcast %236 : vector<8x8x1xf32> to vector<8x8x8xf32>
    %238 = arith.mulf %233, %237 : vector<8x8x8xf32>
    %239 = arith.truncf %238 : vector<8x8x8xf32> to vector<8x8x8xbf16>
    %240 = arith.truncf %220 : vector<8x8x8xf32> to vector<8x8x8xbf16>
    "tpu.trace_start"() <{level = 10 : i32, message = "bqk,bkd->bqd"}> : () -> ()
    %cst_82 = arith.constant dense<0.000000e+00> : vector<8x8x8xf32>
    %241 = tpu.matmul %239, %240, %cst_82 {dimension_numbers = #tpu.dot_dimension_numbers<[2], [1], [1], [2], [0, 0, 0, 1, 1, 2], [0], [0]>} : vector<8x8x8xbf16>, vector<8x8x8xbf16>, vector<8x8x8xf32> -> vector<8x8x8xf32>
    "tpu.trace_stop"() : () -> ()
    %242 = vector.extract_strided_slice %241 {offsets = [0, 0, 0], sizes = [2, 8, 8], strides = [1, 1, 1]} : vector<8x8x8xf32> to vector<2x8x8xf32>
    %243 = vector.extract_strided_slice %241 {offsets = [2, 0, 0], sizes = [2, 8, 8], strides = [1, 1, 1]} : vector<8x8x8xf32> to vector<2x8x8xf32>
    %244 = vector.extract_strided_slice %241 {offsets = [4, 0, 0], sizes = [2, 8, 8], strides = [1, 1, 1]} : vector<8x8x8xf32> to vector<2x8x8xf32>
    %245 = vector.extract_strided_slice %241 {offsets = [6, 0, 0], sizes = [2, 8, 8], strides = [1, 1, 1]} : vector<8x8x8xf32> to vector<2x8x8xf32>
    %246 = tpu.concatenate %242, %243, %244, %245 in 2 : vector<2x8x8xf32>, vector<2x8x8xf32>, vector<2x8x8xf32>, vector<2x8x8xf32> -> vector<2x8x32xf32>
    %247 = vector.shape_cast %246 : vector<2x8x32xf32> to vector<16x32xf32>
    %248 = arith.truncf %247 : vector<16x32xf32> to vector<16x32xbf16>
    %cst_83 = arith.constant dense<0.000000e+00> : vector<16x32xf32>
    %249 = tpu.matmul %248, %181, %cst_83 {dimension_numbers = #tpu.dot_dimension_numbers<[1], [0], [0], [1], [0, 0, 1, 1], [], []>} : vector<16x32xbf16>, vector<32x32xbf16>, vector<16x32xf32> -> vector<16x32xf32>
    %250 = vector.broadcast %190 : vector<1x32xf32> to vector<16x32xf32>
    %251 = arith.addf %249, %250 : vector<16x32xf32>
    %252 = arith.addf %175, %251 : vector<16x32xf32>
    %cst_84 = arith.constant dense<0.000000e+00> : vector<16xf32>
    %253 = vector.multi_reduction <add>, %252, %cst_84 [1] : vector<16x32xf32> to vector<16xf32>
    %254 = vector.shape_cast %253 : vector<16xf32> to vector<16x1xf32>
    %cst_85 = arith.constant 3.200000e+01 : f32
    %255 = vector.broadcast %cst_85 : f32 to vector<16x1xf32>
    %256 = arith.divf %254, %255 : vector<16x1xf32>
    %257 = vector.broadcast %256 : vector<16x1xf32> to vector<16x32xf32>
    %258 = arith.subf %252, %257 : vector<16x32xf32>
    %259 = arith.mulf %258, %258 : vector<16x32xf32>
    %cst_86 = arith.constant dense<0.000000e+00> : vector<16xf32>
    %260 = vector.multi_reduction <add>, %259, %cst_86 [1] : vector<16x32xf32> to vector<16xf32>
    %261 = vector.shape_cast %260 : vector<16xf32> to vector<16x1xf32>
    %cst_87 = arith.constant 3.200000e+01 : f32
    %262 = vector.broadcast %cst_87 : f32 to vector<16x1xf32>
    %263 = arith.divf %261, %262 : vector<16x1xf32>
    %264 = vector.broadcast %256 : vector<16x1xf32> to vector<16x32xf32>
    %265 = arith.subf %252, %264 : vector<16x32xf32>
    %cst_88 = arith.constant 9.99999996E-13 : f32
    %266 = vector.broadcast %cst_88 : f32 to vector<16x1xf32>
    %267 = arith.addf %263, %266 : vector<16x1xf32>
    %268 = math.rsqrt %267 : vector<16x1xf32>
    %269 = vector.broadcast %268 : vector<16x1xf32> to vector<16x32xf32>
    %270 = arith.mulf %265, %269 : vector<16x32xf32>
    %271 = vector.broadcast %192 : vector<1x32xf32> to vector<16x32xf32>
    %272 = arith.mulf %270, %271 : vector<16x32xf32>
    %273 = vector.broadcast %193 : vector<1x32xf32> to vector<16x32xf32>
    %274 = arith.addf %272, %273 : vector<16x32xf32>
    %275 = arith.truncf %274 : vector<16x32xf32> to vector<16x32xbf16>
    %cst_89 = arith.constant dense<0.000000e+00> : vector<16x64xf32>
    %276 = tpu.matmul %275, %183, %cst_89 {dimension_numbers = #tpu.dot_dimension_numbers<[1], [0], [0], [1], [0, 0, 1, 1], [], []>} : vector<16x32xbf16>, vector<32x64xbf16>, vector<16x64xf32> -> vector<16x64xf32>
    %277 = vector.broadcast %185 : vector<1x64xf32> to vector<16x64xf32>
    %278 = arith.addf %276, %277 : vector<16x64xf32>
    %279 = arith.mulf %278, %278 : vector<16x64xf32>
    %280 = arith.mulf %278, %279 : vector<16x64xf32>
    %cst_90 = arith.constant 4.471500e-02 : f32
    %281 = vector.broadcast %cst_90 : f32 to vector<16x64xf32>
    %282 = arith.mulf %281, %280 : vector<16x64xf32>
    %283 = arith.addf %278, %282 : vector<16x64xf32>
    %cst_91 = arith.constant 0.797884583 : f32
    %284 = vector.broadcast %cst_91 : f32 to vector<16x64xf32>
    %285 = arith.mulf %284, %283 : vector<16x64xf32>
    %286 = math.tanh %285 : vector<16x64xf32>
    %cst_92 = arith.constant 1.000000e+00 : f32
    %287 = vector.broadcast %cst_92 : f32 to vector<16x64xf32>
    %288 = arith.addf %287, %286 : vector<16x64xf32>
    %cst_93 = arith.constant 5.000000e-01 : f32
    %289 = vector.broadcast %cst_93 : f32 to vector<16x64xf32>
    %290 = arith.mulf %289, %288 : vector<16x64xf32>
    %291 = arith.mulf %278, %290 : vector<16x64xf32>
    %292 = arith.truncf %291 : vector<16x64xf32> to vector<16x64xbf16>
    %cst_94 = arith.constant dense<0.000000e+00> : vector<16x32xf32>
    %293 = tpu.matmul %292, %187, %cst_94 {dimension_numbers = #tpu.dot_dimension_numbers<[1], [0], [0], [1], [0, 0, 1, 1], [], []>} : vector<16x64xbf16>, vector<64x32xbf16>, vector<16x32xf32> -> vector<16x32xf32>
    %294 = vector.broadcast %191 : vector<1x32xf32> to vector<16x32xf32>
    %295 = arith.addf %293, %294 : vector<16x32xf32>
    %296 = arith.addf %274, %295 : vector<16x32xf32>
    %cst_95 = arith.constant dense<0.000000e+00> : vector<16xf32>
    %297 = vector.multi_reduction <add>, %296, %cst_95 [1] : vector<16x32xf32> to vector<16xf32>
    %298 = vector.shape_cast %297 : vector<16xf32> to vector<16x1xf32>
    %cst_96 = arith.constant 3.200000e+01 : f32
    %299 = vector.broadcast %cst_96 : f32 to vector<16x1xf32>
    %300 = arith.divf %298, %299 : vector<16x1xf32>
    %301 = vector.broadcast %300 : vector<16x1xf32> to vector<16x32xf32>
    %302 = arith.subf %296, %301 : vector<16x32xf32>
    %303 = arith.mulf %302, %302 : vector<16x32xf32>
    %cst_97 = arith.constant dense<0.000000e+00> : vector<16xf32>
    %304 = vector.multi_reduction <add>, %303, %cst_97 [1] : vector<16x32xf32> to vector<16xf32>
    %305 = vector.shape_cast %304 : vector<16xf32> to vector<16x1xf32>
    %cst_98 = arith.constant 3.200000e+01 : f32
    %306 = vector.broadcast %cst_98 : f32 to vector<16x1xf32>
    %307 = arith.divf %305, %306 : vector<16x1xf32>
    %308 = vector.broadcast %300 : vector<16x1xf32> to vector<16x32xf32>
    %309 = arith.subf %296, %308 : vector<16x32xf32>
    %cst_99 = arith.constant 9.99999996E-13 : f32
    %310 = vector.broadcast %cst_99 : f32 to vector<16x1xf32>
    %311 = arith.addf %307, %310 : vector<16x1xf32>
    %312 = math.rsqrt %311 : vector<16x1xf32>
    %313 = vector.broadcast %312 : vector<16x1xf32> to vector<16x32xf32>
    %314 = arith.mulf %309, %313 : vector<16x32xf32>
    %315 = vector.broadcast %194 : vector<1x32xf32> to vector<16x32xf32>
    %316 = arith.mulf %314, %315 : vector<16x32xf32>
    %317 = vector.broadcast %195 : vector<1x32xf32> to vector<16x32xf32>
    %318 = arith.addf %316, %317 : vector<16x32xf32>
    %319 = vector.shape_cast %318 : vector<16x32xf32> to vector<2x8x32xf32>
    %320 = vector.extract_strided_slice %319 {offsets = [0, 0, 0], sizes = [2, 1, 32], strides = [1, 1, 1]} : vector<2x8x32xf32> to vector<2x1x32xf32>
    %321 = vector.shape_cast %320 : vector<2x1x32xf32> to vector<2x32xf32>
    %c0_100 = arith.constant 0 : index
    %c0_101 = arith.constant 0 : index
    %322 = vector.load %arg11[%c0_100, %c0_101] : memref<32x32xbf16, #tpu.memory_space<vmem>>, vector<32x32xbf16>
    %323 = arith.truncf %321 : vector<2x32xf32> to vector<2x32xbf16>
    %cst_102 = arith.constant dense<0.000000e+00> : vector<2x32xf32>
    %324 = tpu.matmul %323, %322, %cst_102 {dimension_numbers = #tpu.dot_dimension_numbers<[1], [0], [0], [1], [0, 0, 1, 1], [], []>} : vector<2x32xbf16>, vector<32x32xbf16>, vector<2x32xf32> -> vector<2x32xf32>
    %c0_103 = arith.constant 0 : index
    %c0_104 = arith.constant 0 : index
    %325 = vector.load %arg12[%c0_103, %c0_104] : memref<1x32xf32, #tpu.memory_space<vmem>>, vector<1x32xf32>
    %326 = vector.broadcast %325 : vector<1x32xf32> to vector<2x32xf32>
    %327 = arith.addf %324, %326 : vector<2x32xf32>
    %328 = math.tanh %327 : vector<2x32xf32>
    %c0_105 = arith.constant 0 : index
    %c0_106 = arith.constant 0 : index
    %329 = vector.load %arg13[%c0_105, %c0_106] : memref<32x128xbf16, #tpu.memory_space<vmem>>, vector<32x128xbf16>
    %330 = arith.truncf %328 : vector<2x32xf32> to vector<2x32xbf16>
    %cst_107 = arith.constant dense<0.000000e+00> : vector<2x128xf32>
    %331 = tpu.matmul %330, %329, %cst_107 {dimension_numbers = #tpu.dot_dimension_numbers<[1], [0], [0], [1], [0, 0, 1, 1], [], []>} : vector<2x32xbf16>, vector<32x128xbf16>, vector<2x128xf32> -> vector<2x128xf32>
    %c0_108 = arith.constant 0 : index
    %c0_109 = arith.constant 0 : index
    %332 = vector.load %arg14[%c0_108, %c0_109] : memref<1x128xf32, #tpu.memory_space<vmem>>, vector<1x128xf32>
    %333 = vector.broadcast %332 : vector<1x128xf32> to vector<2x128xf32>
    %334 = arith.addf %331, %333 : vector<2x128xf32>
    %c0_110 = arith.constant 0 : index
    %c0_111 = arith.constant 0 : index
    %335 = vector.load %arg15[%c0_110, %c0_111] : memref<2x128xf32, #tpu.memory_space<vmem>>, vector<2x128xf32>
    tpu.vector_store %arg15[%c0_110, %c0_111], %334 {strides = array<i32>} : memref<2x128xf32, #tpu.memory_space<vmem>>, vector<2x128xf32>,
    return
  }
}

</mosaic_0001>

<bundles_post_ra>
// kernel: tpu_custom_call.1
= control target key start
LH: loop header
LB: loop body
LE: loop exit
PB: predicated region body
PF: predicated region fallthrough
CT: control target
= control target key end

     0   :  { %20 = vsyncpa [#allocation3], 0  ;;  %s3070_s0 = inlined_call_operand.hbm [shape: f32[16,32], index: 0, kind: input, shape index: {}]   ;;  %s3071_s1 = inlined_call_operand.vmem [shape: f32[2,8], index: 1, kind: input, shape index: {}]   ;;  %s3072_s2 = inlined_call_operand.hbm [shape: f32[1,32], index: 2, kind: input, shape index: {}]   ;;  %s3073_s3 = inlined_call_operand.hbm [shape: f32[1,32], index: 3, kind: input, shape index: {}]   ;;  %s3074_s4 = inlined_call_operand.vmem [shape: bf16[2,32,96], index: 4, kind: input, shape index: {}]   ;;  %s3075_s5 = inlined_call_operand.vmem [shape: f32[2,1,96], index: 5, kind: input, shape index: {}]   ;;  %s3076_s6 = inlined_call_operand.vmem [shape: bf16[2,32,32], index: 6, kind: input, shape index: {}]   ;;  %s3077_s7 = inlined_call_operand.vmem [shape: bf16[2,32,64], index: 7, kind: input, shape index: {}]   ;;  %s3078_s8 = inlined_call_operand.hbm [shape: f32[2,1,64], index: 8, kind: input, shape index: {}]   ;;  %s3079_s9 = inlined_call_operand.vmem [shape: bf16[2,64,32], index: 9, kind: input, shape index: {}]   ;;  %s3080_s10 = inlined_call_operand.vmem [shape: f32[2,6,32], index: 10, kind: input, shape index: {}]   ;;  %s3081_s11 = inlined_call_operand.hbm [shape: bf16[32,32], index: 11, kind: input, shape index: {}]   ;;  %s3082_s12 = inlined_call_operand.vmem [shape: f32[1,32], index: 12, kind: input, shape index: {}]   ;;  %s3083_s13 = inlined_call_operand.hbm [shape: bf16[32,128], index: 13, kind: input, shape index: {}]   ;;  %s3084_s14 = inlined_call_operand.vmem [shape: f32[1,128], index: 14, kind: input, shape index: {}]   ;;  %s3085_s15 = inlined_call_operand.hbm [shape: f32[2,128], index: 15, kind: output, shape index: {}]  }
   0x1   :  { %21 = vsyncpa [#allocation6], 0 }
   0x2   :  { %22 = vsyncpa [#allocation9], 0 }
   0x3   :  { %23 = vsyncpa [#allocation12], 0  ;;  %s45_s20 = sshll.u32 %s3072_s2, 4  ;;  %s46_s20 = int_to_ptr.hbm [resolvable:$true] %s45_s20 }
   0x4   :  { %24 = vsyncpa [#allocation4], 0  ;;  %s2509_s21 = smov [#allocation5]   ;;  %s74_s25 = sshll.u32 %s3078_s8, 4  ;;  %s75_s25 = int_to_ptr.hbm [resolvable:$true] %s74_s25 }
   0x5   :  { %s47_s22 = sshll.u32 %s2509_s21, 4  ;;  %s2510_s26 = smov [#allocation8]   ;;  %s48_s22 = int_to_ptr.vmem [resolvable:$true] %s47_s22 }
   0x6   :  { %50 = dma.hbm_to_vmem [thread:$0]  %s46_s20, 16, %s48_s22, [#allocation6]  }
   0x7   :  { %s76_s27 = sshll.u32 %s2510_s26, 4  ;;  %s2511_s28 = smov 16   ;;  %s77_s27 = int_to_ptr.vmem [resolvable:$true] %s76_s27 }
   0x8   :  { %s2512_s29 = smov 1   ;;  %s29_s16 = sshll.u32 %s3070_s0, 4  ;;  %s30_s16 = int_to_ptr.hbm [resolvable:$true] %s29_s16 }
   0x9   :  { %82 = dma.hbm_to_vmem [thread:$0]  %s75_s25, 32, %s77_s27, [#allocation9], %s2511_s28, %s2511_s28, %s2512_s29  }
   0xa   :  { %s2513_s17 = smov [#allocation2]   ;;  %s56_s20 = sshll.u32 %s3073_s3, 4  ;;  %s57_s20 = int_to_ptr.hbm [resolvable:$true] %s56_s20 }
   0xb   :  { %s31_s18 = sshll.u32 %s2513_s17, 4  ;;  %s2514_s21 = smov 128   ;;  %s32_s18 = int_to_ptr.vmem [resolvable:$true] %s31_s18 }
   0xc   :  { %s2515_s22 = smov 8   ;;  %s2516_s23 = smov [#allocation7]  }
   0xd   :  { %37 = dma.hbm_to_vmem [thread:$0]  %s30_s16, 256, %s32_s18, [#allocation3], %s2514_s21, %s2514_s21, %s2515_s22  }
   0xe   :  { %s58_s24 = sshll.u32 %s2516_s23, 4  ;;  %s91_s27 = sshll.u32 %s3081_s11, 4  ;;  %s59_s24 = int_to_ptr.vmem [resolvable:$true] %s58_s24  ;;  %s92_s27 = int_to_ptr.hbm [resolvable:$true] %s91_s27 }
   0xf   :  { %61 = dma.hbm_to_vmem [thread:$0]  %s57_s20, 16, %s59_s24, [#allocation6]  }
  0x10   :  { %s2517_s0 = smov [#allocation10]   ;;  %s106_s3 = sshll.u32 %s3083_s13, 4  ;;  %s107_s3 = int_to_ptr.hbm [resolvable:$true] %s106_s3 }
  0x11   :  { %s93_s29 = sshll.u32 %s2517_s0, 4  ;;  %s2518_s17 = smov 64   ;;  %s94_s29 = int_to_ptr.vmem [resolvable:$true] %s93_s29 }
  0x12   :  { %s2519_s19 = smov 4   ;;  %s2520_s16 = smov [#allocation11]  }
  0x13   :  { %99 = dma.hbm_to_vmem [thread:$0]  %s92_s27, 256, %s94_s29, [#allocation9], %s2518_s17, %s2518_s17, %s2519_s19  }
  0x14   :  { %s108_s18 = sshll.u32 %s2520_s16, 4  ;;  %s109_s18 = int_to_ptr.vmem [resolvable:$true] %s108_s18 }
  0x15   :  { %114 = dma.hbm_to_vmem [thread:$0]  %s107_s3, 256, %s109_s18, [#allocation12], %s2518_s17, %s2518_s17, %s2519_s19  }
  0x16   :  { %2499 = dma.done.wait [#allocation3], 256  }
  0x17   :  { %2500 = vsyncadd [#allocation3], 4294967040 }
  0x18   :  { %2501 = dma.done.wait [#allocation6], 32  }
  0x19   :  { %2502 = vsyncadd [#allocation6], 4294967264 }
  0x1a   :  { %2503 = dma.done.wait [#allocation9], 288  }
  0x1b   :  { %2504 = vsyncadd [#allocation9], 4294967008 }
  0x1c   :  { %2505 = dma.done.wait [#allocation12], 256  }
  0x1d   :  { %2506 = vsyncadd [#allocation12], 4294967040  ;;  %vm146_vm0 = vcmask 261120   ;;  %v142_v0 = vld [vmem:[#allocation2] sm:$0xff]  ;;  %v143_v2 = vld [vmem:[#allocation2 + $0x8] sm:$0xff]  ;;  %v2521_v4 = vmov 32.0  }
  0x1e   :  { %v147_v1 = vsel %vm146_vm0, %v142_v0, 0.0  ;;  %v150_v3 = vsel %vm146_vm0, %v143_v2, 0.0  ;;  %2235 = vrcp.f32 %v2521_v4  ;;  %v2155_v21 = vld [vmem:[%s3074_s4 + $0x8] sm:$0xff]  ;;  %v2154_v23 = vld [vmem:[%s3074_s4] sm:$0xff]  ;;  %v2227_v42 = vld [vmem:[#allocation5] ss:$0 sm:$0xff] }
  0x1f   :  { %148 = vadd.xlane.f32.xlu0 %v147_v1  ;;  %272 = vmatpush.bf16.msra.mxu0 %v2155_v21  ;;  %v2228_v47 = vld [vmem:[#allocation7] ss:$0 sm:$0xff]  ;;  %v2229_v52 = vld [vmem:[%s3075_s5] ss:$0 sm:$0xff]  ;;  %s2522_s24 = smov 104   ;;  %s2523_s25 = smov 120  }
  0x20   :  { %s2524_s26 = smov 112   ;;  %s2525_s27 = smov 96   ;;  %vm313_vm8 = vcmask 64512   ;;  %vm220_vm9 = vcmask 1043456   ;;  %vm218_vm10 = vcmask 1041408   ;;  %vm222_vm11 = vcmask 1045504  }
  0x21   :  { %vm831_vm12 = vcmask 130048   ;;  %vm834_vm13 = vcmask 195584   ;;  %s2527_s16 = smov [#allocation13]  }
  0x22   :  { %s1979_s18 = sshll.u32 %s2527_s16, 4  ;;  %s1980_s18 = int_to_ptr.vmem [resolvable:$true] %s1979_s18 }
  0x23   :  { %273 = vmatpush.bf16.msra.mxu0 %v2154_v23 }
  0x24   :  { %v2236_v5 = vpop.eup %2235 }
  0x25   :  { %v154_v6 = vmul.f32 32.0, %v2236_v5  ;;  %vm158_vm1 = vweird.f32 %v2236_v5 }
  0x27   :  { %151 = vadd.xlane.f32.xlu0 %v150_v3  ;;  %v155_v7 = vsub.f32 1.0, %v154_v6 }
  0x29   :  { %v156_v8 = vmul.f32 %v2236_v5, %v155_v7 }
  0x2b   :  { %v157_v9 = vadd.f32 %v2236_v5, %v156_v8 }
  0x2d   :  { %v2635_v10 = vsel %vm158_vm1, %v2236_v5, %v157_v9 }
  0x92   :  { %v149_v11 = vpop.xlane.xlu0 %148 }
  0x93   :  { %v160_v12 = vmul.f32 %v2635_v10, %v149_v11 }
  0x95   :  { %v162_v13 = vsub.f32 %v142_v0, %v160_v12 }
  0x97   :  { %v164_v14 = vmul.f32 %v162_v13, %v162_v13 }
  0x99   :  { %v166_v15 = vsel %vm146_vm0, %v164_v14, 0.0 }
  0x9a   :  { %167 = vadd.xlane.f32.xlu1 %v166_v15  ;;  %v152_v16 = vpop.xlane.xlu0 %151 }
  0x9b   :  { %v161_v17 = vmul.f32 %v2635_v10, %v152_v16 }
  0x9d   :  { %v163_v18 = vsub.f32 %v143_v2, %v161_v17 }
  0x9f   :  { %v165_v19 = vmul.f32 %v163_v18, %v163_v18 }
  0xa1   :  { %v169_v20 = vsel %vm146_vm0, %v165_v19, 0.0 }
  0xa2   :  { %170 = vadd.xlane.f32.xlu1 %v169_v20 }
 0x10d   :  { %v168_v22 = vpop.xlane.xlu1 %167 }
 0x10e   :  { %v172_v24 = vmul.f32 %v168_v22, %v2635_v10 }
 0x110   :  { %v174_v25 = vadd.f32 1e-12, %v172_v24 }
 0x112   :  { %2237 = vrsqrt.f32 %v174_v25  ;;  %vm182_vm3 = vweird.f32 %v174_v25 }
 0x115   :  { %v171_v26 = vpop.xlane.xlu1 %170 }
 0x116   :  { %v173_v27 = vmul.f32 %v171_v26, %v2635_v10 }
 0x118   :  { %v2238_v28 = vpop.eup %2237  ;;  %v175_v29 = vadd.f32 1e-12, %v173_v27 }
 0x119   :  { %v177_v30 = vmul.f32 %v2238_v28, %v174_v25  ;;  %vm183_vm2 = vweird.f32 %v2238_v28 }
 0x11a   :  { %2239 = vrsqrt.f32 %v175_v29  ;;  %vm184_vm4 = vmor %vm182_vm3, %vm183_vm2  ;;  %vm192_vm6 = vweird.f32 %v175_v29 }
 0x11b   :  { %v178_v31 = vmul.f32 %v2238_v28, %v177_v30 }
 0x11d   :  { %v179_v32 = vmul.f32 0.5, %v178_v31 }
 0x11f   :  { %v180_v33 = vsub.f32 1.5, %v179_v32 }
 0x120   :  { %v2240_v34 = vpop.eup %2239 }
 0x121   :  { %v181_v35 = vmul.f32 %v2238_v28, %v180_v33  ;;  %v187_v36 = vmul.f32 %v2240_v34, %v175_v29  ;;  %vm193_vm5 = vweird.f32 %v2240_v34 }
 0x122   :  { %vm194_vm7 = vmor %vm192_vm6, %vm193_vm5  ;;  %vm997_vm5 = vcmask 523264  }
 0x123   :  { %v188_v37 = vmul.f32 %v2240_v34, %v187_v36  ;;  %v185_v38 = vsel %vm184_vm4, %v2238_v28, %v181_v35  ;;  %v208_v36 = vld [vmem:[%s3071_s1] sm:$0x3]  ;;  %s2526_s1 = smov 24  }
 0x124   :  { %v196_v41 = vmul.f32 %v185_v38, %v162_v13 }
 0x125   :  { %v189_v39 = vmul.f32 0.5, %v188_v37 }
 0x126   :  { %v201_v46 = vmul.f32 %v2227_v42, %v196_v41 }
 0x127   :  { %v190_v40 = vsub.f32 1.5, %v189_v39  ;;  %v209_v39 = vsub.f32 1.0, %v208_v36 }
 0x128   :  { %v2649_v49 = vadd.f32 %v2228_v47, %v201_v46 }
 0x129   :  { %v191_v43 = vmul.f32 %v2240_v34, %v190_v40  ;;  %v210_v40 = vmul.f32 -10000.0, %v209_v39 }
 0x12b   :  { %v195_v44 = vsel %vm194_vm7, %v2240_v34, %v191_v43  ;;  %v214_v46 = vrot.slane %v210_v40, 4 }
 0x12c   :  { %v197_v45 = vmul.f32 %v195_v44, %v163_v18  ;;  %v212_v44 = vrot.slane %v210_v40, 6 }
 0x12e   :  { %v202_v48 = vmul.f32 %v2227_v42, %v197_v45 }
 0x130   :  { %v2651_v50 = vadd.f32 %v2228_v47, %v202_v48  ;;  %v219_v47 = vsel %vm218_vm10, %v210_v40, %v212_v44  ;;  %v216_v48 = vrot.slane %v210_v40, 2 }
 0x132   :  { %v247_v51 = vpack.c.bf16 %v2651_v50, %v2649_v49 }
 0x134   :  { %2002 = vmatmul.msk.bf16.vlgmr.msra.gmra.mxu0 %vm146_vm0, %v247_v51 }
 0x1b1   :  { %v275_v53 = vpop.f32.mrf.mxu0 }
 0x1b2   :  { %v276_v54 = vadd.f32 %v2229_v52, %v275_v53 }
 0x1b4   :  { %294 = vrot.lane.b32.xlu1 %v276_v54, %s2522_s24  ;;  %282 = vrot.lane.b32.xlu2 %v276_v54, %s2523_s25  ;;  %v300_v60 = vpack.c.bf16 %v276_v54, %v276_v54 }
 0x1b6   :  { %v309_v61 = vunpack.c.l.b16 %v300_v60 }
 0x1b8   :  { %v310_v62 = vpack.c.b16 %v309_v61, %v309_v61 }
 0x1b9   :  { %v277_v55 = vpop.f32.mrf.mxu0 }
 0x1ba   :  { %v278_v56 = vadd.f32 %v2229_v52, %v277_v55  ;;  %v221_v52 = vsel %vm220_vm9, %v219_v47, %v214_v46 }
 0x1bc   :  { %290 = vrot.lane.b32.xlu0 %v278_v56, %s2524_s26  ;;  %284 = vrot.lane.b32.xlu2 %v278_v56, %s2523_s25  ;;  %v301_v57 = vpack.c.bf16 %v278_v56, %v278_v56 }
 0x1be   :  { %v334_v58 = vunpack.c.l.b16 %v301_v57 }
 0x1c0   :  { %v335_v59 = vpack.c.b16 %v334_v58, %v334_v58 }
 0x1c4   :  { %288 = vrot.lane.b32.xlu2 %v276_v54, %s2524_s26  ;;  %v2712_v54 = vsel %vm222_vm11, %v221_v52, %v216_v48 }
 0x1c5   :  { %v510_v55 = vrot.slane %v2712_v54, 1  ;;  %v517_v61 = vperm.slane %v2712_v54, 0  ;;  %v514_v52 = vrot.slane %v2712_v54, 5 }
 0x1c7   :  { %v2717_v58 = vperm.slane %v510_v55, 0 }
 0x1cc   :  { %296 = vrot.lane.b32.xlu2 %v278_v56, %s2522_s24 }
 0x1d4   :  { %336 = vrot.lane.b32.xlu2 %v335_v59, %s2525_s27 }
 0x1dc   :  { %311 = vrot.lane.b32.xlu2 %v310_v62, %s2525_s27 }
 0x20e   :  { %v283_v63 = vpop.permute.xlu2 %282 }
 0x20f   :  { %v302_v0 = vpack.c.bf16 %v283_v63, %v283_v63 }
 0x211   :  { %v358_v1 = vunpack.c.l.b16 %v302_v0 }
 0x213   :  { %v359_v2 = vpack.c.b16 %v358_v1, %v358_v1 }
 0x215   :  { %360 = vrot.lane.b32.xlu0 %v359_v2, %s2525_s27 }
 0x216   :  { %v285_v3 = vpop.permute.xlu2 %284 }
 0x217   :  { %v303_v4 = vpack.c.bf16 %v285_v3, %v285_v3 }
 0x219   :  { %v382_v5 = vunpack.c.l.b16 %v303_v4 }
 0x21b   :  { %v2668_v6 = vpack.c.b16 %v382_v5, %v382_v5 }
 0x21d   :  { %384 = vrot.lane.b32.xlu1 %v2668_v6, %s2525_s27 }
 0x21e   :  { %v289_v7 = vpop.permute.xlu2 %288 }
 0x21f   :  { %v304_v8 = vpack.c.bf16 %v289_v7, %v289_v7  ;;  %v511_v7 = vrot.slane %v2712_v54, 2 }
 0x221   :  { %v406_v9 = vunpack.c.l.b16 %v304_v8 }
 0x223   :  { %v2672_v11 = vpack.c.b16 %v406_v9, %v406_v9 }
 0x225   :  { %408 = vrot.lane.b32.xlu1 %v2672_v11, %s2525_s27 }
 0x226   :  { %v295_v12 = vpop.permute.xlu1 %294  ;;  %v297_v13 = vpop.permute.xlu2 %296 }
 0x227   :  { %v306_v14 = vpack.c.bf16 %v295_v12, %v295_v12  ;;  %v307_v22 = vpack.c.bf16 %v297_v13, %v297_v13 }
 0x229   :  { %v454_v15 = vunpack.c.l.b16 %v306_v14  ;;  %v478_v25 = vunpack.c.l.b16 %v307_v22 }
 0x22b   :  { %v2676_v16 = vpack.c.b16 %v454_v15, %v454_v15  ;;  %v2689_v27 = vpack.c.b16 %v478_v25, %v478_v25  ;;  %v512_v25 = vrot.slane %v2712_v54, 3 }
 0x22d   :  { %679 = vrot.lane.b32.xlu1 %v359_v2, %s2518_s17  ;;  %456 = vrot.lane.b32.xlu2 %v2676_v16, %s2525_s27 }
 0x22e   :  { %v291_v17 = vpop.permute.xlu0 %290  ;;  %v337_v18 = vpop.permute.xlu2 %336 }
 0x22f   :  { %v305_v19 = vpack.c.bf16 %v291_v17, %v291_v17  ;;  %v342_v20 = vsel %vm313_vm8, %v337_v18, 0  ;;  %v513_v17 = vrot.slane %v2712_v54, 4 }
 0x230   :  { %351 = vmatpush.bf16.xpose.msra.mxu2 %v342_v20 }
 0x231   :  { %v430_v21 = vunpack.c.l.b16 %v305_v19 }
 0x233   :  { %v2682_v23 = vpack.c.b16 %v430_v21, %v430_v21 }
 0x235   :  { %432 = vrot.lane.b32.xlu0 %v2682_v23, %s2525_s27  ;;  %658 = vrot.lane.b32.xlu2 %v335_v59, %s2518_s17 }
 0x236   :  { %v312_v24 = vpop.permute.xlu2 %311 }
 0x237   :  { %2004 = vmatmul.msk.bf16.vlgmr.msra.gmra.mxu2 %vm313_vm8, %v301_v57  ;;  %v318_v26 = vsel %vm313_vm8, %v312_v24, 0  ;;  %v515_v24 = vrot.slane %v2712_v54, 6 }
 0x238   :  { %327 = vmatpush.bf16.xpose.msra.mxu1 %v318_v26 }
 0x23d   :  { %480 = vrot.lane.b32.xlu0 %v2689_v27, %s2525_s27 }
 0x23f   :  { %2003 = vmatmul.msk.bf16.vlgmr.msra.gmra.mxu1 %vm313_vm8, %v300_v60 }
 0x245   :  { %637 = vrot.lane.b32.xlu0 %v310_v62, %s2518_s17 }
 0x287   :  { %v361_v28 = vpop.permute.xlu0 %360  ;;  %v457_v29 = vpop.permute.xlu2 %456 }
 0x288   :  { %v366_v30 = vsel %vm313_vm8, %v361_v28, 0  ;;  %v462_v31 = vsel %vm313_vm8, %v457_v29, 0 }
 0x289   :  { %375 = vmatpush.bf16.xpose.msra.mxu3 %v366_v30  ;;  %v2740_v30 = vperm.slane %v515_v24, 0 }
 0x28f   :  { %v385_v32 = vpop.permute.xlu1 %384  ;;  %v659_v41 = vpop.permute.xlu2 %658 }
 0x290   :  { %2005 = vmatmul.msk.bf16.vlgmr.msra.gmra.mxu3 %vm313_vm8, %v302_v0  ;;  %v390_v33 = vsel %vm313_vm8, %v385_v32, 0  ;;  %v664_v45 = vsel %vm220_vm9, %v659_v41, 0 }
 0x291   :  { %471 = vmatpush.bf16.xpose.msrb.mxu3 %v462_v31  ;;  %399 = vmatpush.bf16.xpose.msrb.mxu0 %v390_v33  ;;  %v2742_v31 = vperm.slane %v512_v25, 0 }
 0x297   :  { %v409_v34 = vpop.permute.xlu1 %408 }
 0x298   :  { %2006 = vmatmul.msk.bf16.vlgmr.msrb.gmra.mxu0 %vm313_vm8, %v303_v4  ;;  %v414_v35 = vsel %vm313_vm8, %v409_v34, 0 }
 0x299   :  { %423 = vmatpush.bf16.xpose.msrb.mxu1 %v414_v35 }
 0x29f   :  { %v680_v37 = vpop.permute.xlu1 %679 }
 0x2a0   :  { %v685_v38 = vsel %vm220_vm9, %v680_v37, 0  ;;  %2007 = vmatmul.msk.bf16.vlgmr.msrb.gmra.mxu1 %vm313_vm8, %v304_v8  ;;  %2009 = vmatmul.msk.bf16.vlgmr.msrb.gmra.mxu3 %vm313_vm8, %v306_v14  ;;  %v2726_v8 = vperm.slane %v511_v7, 0 }
 0x2a1   :  { %694 = vmatpush.bf16.msra.mxu3 %v685_v38 }
 0x2a7   :  { %v433_v42 = vpop.permute.xlu0 %432 }
 0x2a8   :  { %v438_v43 = vsel %vm313_vm8, %v433_v42, 0 }
 0x2a9   :  { %447 = vmatpush.bf16.xpose.msrb.mxu2 %v438_v43 }
 0x2af   :  { %v481_v51 = vpop.permute.xlu0 %480 }
 0x2b0   :  { %v486_v53 = vsel %vm313_vm8, %v481_v51, 0  ;;  %2008 = vmatmul.msk.bf16.vlgmr.msrb.gmra.mxu2 %vm313_vm8, %v305_v19  ;;  %v2734_v19 = vperm.slane %v513_v17, 0 }
 0x2b1   :  { %673 = vmatpush.bf16.msra.mxu2 %v664_v45  ;;  %495 = vmatpush.bf16.xpose.msra.mxu0 %v486_v53 }
 0x2b7   :  { %v638_v56 = vpop.permute.xlu0 %637 }
 0x2b8   :  { %v643_v57 = vsel %vm220_vm9, %v638_v56, 0  ;;  %2010 = vmatmul.msk.bf16.vlgmr.msra.gmra.mxu0 %vm313_vm8, %v307_v22 }
 0x2b9   :  { %652 = vmatpush.bf16.msra.mxu1 %v643_v57 }
 0x2ba   :  { %v353_v59 = vpop.f32.mrf.mxu2 }
 0x2bb   :  { %v502_v60 = vmul.f32 0.35355338, %v353_v59 }
 0x2bc   :  { %v329_v62 = vpop.f32.mrf.mxu1 }
 0x2bd   :  { %v501_v63 = vmul.f32 0.35355338, %v329_v62  ;;  %v534_v0 = vadd.f32 %v2717_v58, %v502_v60  ;;  %v2751_v60 = vperm.slane %v514_v52, 0 }
 0x2bf   :  { %v544_v1 = vsel %vm313_vm8, %v534_v0, -inf  ;;  %v533_v2 = vadd.f32 %v517_v61, %v501_v63  ;;  %v516_v63 = vrot.slane %v2712_v54, 7 }
 0x2c0   :  { %545 = vmax.xlane.f32.xlu2 %v544_v1 }
 0x2c1   :  { %v541_v3 = vsel %vm313_vm8, %v533_v2, -inf }
 0x2c2   :  { %v355_v4 = vpop.f32.mrf.mxu2  ;;  %542 = vmax.xlane.f32.xlu0 %v541_v3 }
 0x2c4   :  { %v331_v5 = vpop.f32.mrf.mxu1 }
 0x313   :  { %v377_v9 = vpop.f32.mrf.mxu3 }
 0x314   :  { %v503_v12 = vmul.f32 0.35355338, %v377_v9 }
 0x315   :  { %v401_v13 = vpop.f32.mrf.mxu0 }
 0x316   :  { %v2729_v14 = vadd.f32 %v2726_v8, %v503_v12  ;;  %v504_v28 = vmul.f32 0.35355338, %v401_v13 }
 0x318   :  { %v547_v15 = vsel %vm313_vm8, %v2729_v14, -inf  ;;  %v536_v36 = vadd.f32 %v2742_v31, %v504_v28 }
 0x319   :  { %548 = vmax.xlane.f32.xlu1 %v547_v15 }
 0x31a   :  { %v550_v38 = vsel %vm313_vm8, %v536_v36, -inf }
 0x31b   :  { %v379_v18 = vpop.f32.mrf.mxu3 }
 0x31d   :  { %v403_v20 = vpop.f32.mrf.mxu0  ;;  %v425_v21 = vpop.f32.mrf.mxu1 }
 0x31e   :  { %v505_v22 = vmul.f32 0.35355338, %v425_v21 }
 0x320   :  { %v537_v26 = vadd.f32 %v2734_v19, %v505_v22 }
 0x322   :  { %v553_v29 = vsel %vm313_vm8, %v537_v26, -inf }
 0x323   :  { %554 = vmax.xlane.f32.xlu2 %v553_v29  ;;  %v473_v32 = vpop.f32.mrf.mxu3 }
 0x324   :  { %v507_v33 = vmul.f32 0.35355338, %v473_v32 }
 0x325   :  { %v427_v34 = vpop.f32.mrf.mxu1 }
 0x326   :  { %v539_v35 = vadd.f32 %v2740_v30, %v507_v33 }
 0x328   :  { %v559_v37 = vsel %vm313_vm8, %v539_v35, -inf }
 0x329   :  { %560 = vmax.xlane.f32.xlu0 %v559_v37 }
 0x32b   :  { %551 = vmax.xlane.f32.xlu2 %v550_v38  ;;  %v475_v39 = vpop.f32.mrf.mxu3 }
 0x333   :  { %v449_v40 = vpop.f32.mrf.mxu2  ;;  %v546_v41 = vpop.xlane.xlu2 %545 }
 0x334   :  { %v566_v42 = vsub.f32 %v534_v0, %v546_v41  ;;  %v506_v57 = vmul.f32 0.35355338, %v449_v40 }
 0x335   :  { %v497_v43 = vpop.f32.mrf.mxu0  ;;  %v543_v44 = vpop.xlane.xlu0 %542 }
 0x336   :  { %v575_v45 = vmul.f32 1.442695, %v566_v42  ;;  %v565_v46 = vsub.f32 %v533_v2, %v543_v44  ;;  %v538_v62 = vadd.f32 %v2751_v60, %v506_v57  ;;  %v508_v0 = vmul.f32 0.35355338, %v497_v43 }
 0x337   :  { %v2758_v2 = vperm.slane %v516_v63, 0 }
 0x338   :  { %2241 = vpow2.f32 %v575_v45  ;;  %v573_v47 = vmul.f32 1.442695, %v565_v46  ;;  %v556_v1 = vsel %vm313_vm8, %v538_v62, -inf }
 0x339   :  { %v540_v3 = vadd.f32 %v2758_v2, %v508_v0 }
 0x33a   :  { %2243 = vpow2.f32 %v573_v47 }
 0x33b   :  { %v451_v48 = vpop.f32.mrf.mxu2  ;;  %v562_v4 = vsel %vm313_vm8, %v540_v3, -inf }
 0x33d   :  { %v499_v51 = vpop.f32.mrf.mxu0 }
 0x33e   :  { %v2242_v53 = vpop.eup %2241 }
 0x33f   :  { %v592_v55 = vsel %vm313_vm8, %v2242_v53, 0.0 }
 0x340   :  { %v2244_v56 = vpop.eup %2243  ;;  %593 = vadd.xlane.f32.xlu0 %v592_v55 }
 0x341   :  { %v589_v59 = vsel %vm313_vm8, %v2244_v56, 0.0 }
 0x342   :  { %590 = vadd.xlane.f32.xlu1 %v589_v59 }
 0x343   :  { %700 = vrot.lane.b32.xlu2 %v2668_v6, %s2518_s17 }
 0x34a   :  { %557 = vmax.xlane.f32.xlu1 %v556_v1 }
 0x352   :  { %563 = vmax.xlane.f32.xlu1 %v562_v4 }
 0x36b   :  { %742 = vrot.lane.b32.xlu1 %v2682_v23, %s2518_s17 }
 0x38c   :  { %v549_v5 = vpop.xlane.xlu1 %548 }
 0x38d   :  { %v567_v9 = vsub.f32 %v2729_v14, %v549_v5 }
 0x38f   :  { %v577_v13 = vmul.f32 1.442695, %v567_v9 }
 0x396   :  { %v555_v6 = vpop.xlane.xlu2 %554 }
 0x397   :  { %v569_v7 = vsub.f32 %v537_v26, %v555_v6 }
 0x399   :  { %v581_v12 = vmul.f32 1.442695, %v569_v7 }
 0x39b   :  { %2245 = vpow2.f32 %v581_v12 }
 0x39c   :  { %v561_v15 = vpop.xlane.xlu0 %560  ;;  %2247 = vpow2.f32 %v577_v13 }
 0x39d   :  { %v571_v17 = vsub.f32 %v539_v35, %v561_v15 }
 0x39e   :  { %v552_v18 = vpop.xlane.xlu2 %551 }
 0x39f   :  { %v585_v20 = vmul.f32 1.442695, %v571_v17  ;;  %v568_v21 = vsub.f32 %v536_v36, %v552_v18 }
 0x3a1   :  { %v2765_v22 = vpop.eup %2245  ;;  %2249 = vpow2.f32 %v585_v20  ;;  %v579_v24 = vmul.f32 1.442695, %v568_v21 }
 0x3a2   :  { %v601_v23 = vsel %vm313_vm8, %v2765_v22, 0.0  ;;  %v2248_v25 = vpop.eup %2247 }
 0x3a3   :  { %2251 = vpow2.f32 %v579_v24  ;;  %602 = vadd.xlane.f32.xlu2 %v601_v23  ;;  %v595_v33 = vsel %vm313_vm8, %v2248_v25, 0.0 }
 0x3a6   :  { %v701_v14 = vpop.permute.xlu2 %700 }
 0x3a7   :  { %v2250_v26 = vpop.eup %2249  ;;  %v706_v28 = vsel %vm220_vm9, %v701_v14, 0 }
 0x3a8   :  { %715 = vmatpush.bf16.msrb.mxu0 %v706_v28  ;;  %v607_v29 = vsel %vm313_vm8, %v2250_v26, 0.0 }
 0x3a9   :  { %v2252_v32 = vpop.eup %2251  ;;  %608 = vadd.xlane.f32.xlu1 %v607_v29 }
 0x3aa   :  { %v598_v34 = vsel %vm313_vm8, %v2252_v32, 0.0 }
 0x3ab   :  { %596 = vadd.xlane.f32.xlu2 %v595_v33  ;;  %599 = vadd.xlane.f32.xlu0 %v598_v34 }
 0x3b3   :  { %v594_v35 = vpop.xlane.xlu0 %593 }
 0x3b4   :  { %2253 = vrcp.f32 %v594_v35 }
 0x3b5   :  { %v591_v36 = vpop.xlane.xlu1 %590 }
 0x3b6   :  { %2255 = vrcp.f32 %v591_v36 }
 0x3ba   :  { %v2254_v37 = vpop.eup %2253 }
 0x3bb   :  { %v622_v38 = vmul.f32 %v2254_v37, %v2242_v53 }
 0x3bc   :  { %v2256_v39 = vpop.eup %2255 }
 0x3bd   :  { %v630_v40 = vpack.c.bf16 %v622_v38, %v622_v38  ;;  %v621_v41 = vmul.f32 %v2256_v39, %v2244_v56  ;;  %v558_v42 = vpop.xlane.xlu1 %557 }
 0x3be   :  { %v570_v43 = vsub.f32 %v538_v62, %v558_v42 }
 0x3bf   :  { %v629_v44 = vpack.c.bf16 %v621_v41, %v621_v41  ;;  %2012 = vmatmul.msk.bf16.vlgmr.msra.gmra.mxu2 %vm313_vm8, %v630_v40 }
 0x3c0   :  { %v583_v45 = vmul.f32 1.442695, %v570_v43 }
 0x3c1   :  { %2011 = vmatmul.msk.bf16.vlgmr.msra.gmra.mxu1 %vm313_vm8, %v629_v44 }
 0x3c2   :  { %2257 = vpow2.f32 %v583_v45  ;;  %784 = vrot.lane.b32.xlu1 %v2689_v27, %s2518_s17 }
 0x3c3   :  { %763 = vrot.lane.b32.xlu2 %v2676_v16, %s2518_s17 }
 0x3c5   :  { %v564_v46 = vpop.xlane.xlu1 %563 }
 0x3c6   :  { %v572_v47 = vsub.f32 %v540_v3, %v564_v46 }
 0x3c8   :  { %v2258_v48 = vpop.eup %2257  ;;  %v587_v51 = vmul.f32 1.442695, %v572_v47 }
 0x3c9   :  { %v604_v52 = vsel %vm313_vm8, %v2258_v48, 0.0 }
 0x3ca   :  { %2259 = vpow2.f32 %v587_v51  ;;  %605 = vadd.xlane.f32.xlu0 %v604_v52 }
 0x3d0   :  { %v2260_v53 = vpop.eup %2259 }
 0x3d1   :  { %v610_v55 = vsel %vm313_vm8, %v2260_v53, 0.0 }
 0x3d2   :  { %611 = vadd.xlane.f32.xlu0 %v610_v55  ;;  %v2157_v55 = vld [vmem:[%s3076_s6 + $0x8] sm:$0xff] }
 0x3dd   :  { %v743_v56 = vpop.permute.xlu1 %742 }
 0x3de   :  { %v748_v57 = vsel %vm220_vm9, %v743_v56, 0  ;;  %v2156_v56 = vld [vmem:[%s3076_s6] sm:$0xff] }
 0x3df   :  { %757 = vmatpush.bf16.msrb.mxu2 %v748_v57 }
 0x3e6   :  { %721 = vrot.lane.b32.xlu0 %v2672_v11, %s2518_s17 }
 0x416   :  { %v603_v16 = vpop.xlane.xlu2 %602 }
 0x41c   :  { %v609_v6 = vpop.xlane.xlu1 %608 }
 0x41e   :  { %v600_v27 = vpop.xlane.xlu0 %599  ;;  %v597_v59 = vpop.xlane.xlu2 %596 }
 0x41f   :  { %2261 = vrcp.f32 %v600_v27 }
 0x420   :  { %2263 = vrcp.f32 %v597_v59 }
 0x421   :  { %2265 = vrcp.f32 %v609_v6 }
 0x425   :  { %v2262_v62 = vpop.eup %2261 }
 0x426   :  { %v2264_v63 = vpop.eup %2263  ;;  %v624_v0 = vmul.f32 %v2262_v62, %v2252_v32  ;;  %v764_v1 = vpop.permute.xlu2 %763 }
 0x427   :  { %v623_v3 = vmul.f32 %v2264_v63, %v2248_v25  ;;  %v769_v4 = vsel %vm220_vm9, %v764_v1, 0  ;;  %v2266_v11 = vpop.eup %2265 }
 0x428   :  { %v632_v5 = vpack.c.bf16 %v624_v0, %v624_v0  ;;  %778 = vmatpush.bf16.msrb.mxu3 %v769_v4  ;;  %v627_v12 = vmul.f32 %v2266_v11, %v2250_v26 }
 0x429   :  { %v631_v7 = vpack.c.bf16 %v623_v3, %v623_v3 }
 0x42a   :  { %2014 = vmatmul.msk.bf16.vlgmr.msrb.gmra.mxu0 %vm313_vm8, %v632_v5  ;;  %v635_v15 = vpack.c.bf16 %v627_v12, %v627_v12 }
 0x42b   :  { %2013 = vmatmul.msk.bf16.vlgmr.msra.gmra.mxu3 %vm313_vm8, %v631_v7 }
 0x434   :  { %v785_v9 = vpop.permute.xlu1 %784 }
 0x435   :  { %v790_v13 = vsel %vm220_vm9, %v785_v9, 0 }
 0x436   :  { %799 = vmatpush.bf16.msra.mxu0 %v790_v13  ;;  %v2813_v13 = vld [vmem:[%s3080_s10] sm:$0x3f] }
 0x43b   :  { %2017 = vmatmul.msk.bf16.vlgmr.msrb.gmra.mxu3 %vm313_vm8, %v635_v15  ;;  %v838_v15 = vperm.slane %v2813_v13, 0 }
 0x43d   :  { %v606_v17 = vpop.xlane.xlu0 %605 }
 0x43e   :  { %2267 = vrcp.f32 %v606_v17  ;;  %v654_v18 = vpop.f32.mrf.mxu1 }
 0x442   :  { %v675_v20 = vpop.f32.mrf.mxu2 }
 0x444   :  { %v2268_v21 = vpop.eup %2267 }
 0x445   :  { %v626_v24 = vmul.f32 %v2268_v21, %v2258_v48  ;;  %v612_v23 = vpop.xlane.xlu0 %611 }
 0x446   :  { %2269 = vrcp.f32 %v612_v23  ;;  %v656_v25 = vpop.f32.mrf.mxu1 }
 0x447   :  { %v634_v14 = vpack.c.bf16 %v626_v24, %v626_v24  ;;  %2271 = vrcp.f32 %v603_v16 }
 0x449   :  { %2016 = vmatmul.msk.bf16.vlgmr.msrb.gmra.mxu2 %vm313_vm8, %v634_v14 }
 0x44a   :  { %v677_v28 = vpop.f32.mrf.mxu2 }
 0x44c   :  { %v2270_v26 = vpop.eup %2269 }
 0x44d   :  { %v628_v29 = vmul.f32 %v2270_v26, %v2260_v53  ;;  %v2272_v33 = vpop.eup %2271 }
 0x44e   :  { %v625_v34 = vmul.f32 %v2272_v33, %v2765_v22 }
 0x44f   :  { %v636_v32 = vpack.c.bf16 %v628_v29, %v628_v29 }
 0x450   :  { %v633_v37 = vpack.c.bf16 %v625_v34, %v625_v34 }
 0x451   :  { %2018 = vmatmul.msk.bf16.vlgmr.msra.gmra.mxu0 %vm313_vm8, %v636_v32 }
 0x458   :  { %v722_v35 = vpop.permute.xlu0 %721 }
 0x459   :  { %v727_v36 = vsel %vm220_vm9, %v722_v35, 0 }
 0x45a   :  { %736 = vmatpush.bf16.msrb.mxu1 %v727_v36 }
 0x45d   :  { %2015 = vmatmul.msk.bf16.vlgmr.msrb.gmra.mxu1 %vm313_vm8, %v633_v37 }
 0x45e   :  { %860 = vmatpush.bf16.msra.mxu1 %v2157_v55 }
 0x462   :  { %861 = vmatpush.bf16.msra.mxu1 %v2156_v56 }
 0x4a7   :  { %v717_v38 = vpop.f32.mrf.mxu0 }
 0x4ae   :  { %v696_v39 = vpop.f32.mrf.mxu3 }
 0x4af   :  { %v2197_v40 = vpack.i.bf16 %v717_v38, %v696_v39  ;;  %v719_v41 = vpop.f32.mrf.mxu0 }
 0x4b0   :  { %v2158_v41 = vld [vmem:[%s3077_s7] sm:$0xff] }
 0x4b1   :  { %2198 = vrot.lane.b32.xlu0 %v2197_v40, %s2515_s22 }
 0x4b6   :  { %v698_v42 = vpop.f32.mrf.mxu3 }
 0x4be   :  { %v780_v43 = vpop.f32.mrf.mxu3 }
 0x4c6   :  { %v782_v44 = vpop.f32.mrf.mxu3 }
 0x4cc   :  { %v759_v45 = vpop.f32.mrf.mxu2 }
 0x4ce   :  { %v801_v46 = vpop.f32.mrf.mxu0 }
 0x4cf   :  { %v2207_v47 = vpack.i.bf16 %v801_v46, %v780_v43 }
 0x4d1   :  { %2208 = vrot.lane.b32.xlu1 %v2207_v47, %s2526_s1 }
 0x4d4   :  { %v761_v22 = vpop.f32.mrf.mxu2 }
 0x4d6   :  { %v803_v48 = vpop.f32.mrf.mxu0 }
 0x4da   :  { %v738_v51 = vpop.f32.mrf.mxu1 }
 0x4db   :  { %v2202_v52 = vpack.i.bf16 %v759_v45, %v738_v51 }
 0x4dd   :  { %2203 = vrot.lane.b32.xlu2 %v2202_v52, %s2511_s28 }
 0x4e2   :  { %v740_v53 = vpop.f32.mrf.mxu1 }
 0x523   :  { %v2199_v57 = vpop.permute.xlu0 %2198 }
 0x524   :  { %v2201_v27 = vunpack.i.h.bf16 %v2199_v57  ;;  %v2200_v59 = vunpack.i.l.bf16 %v2199_v57 }
 0x526   :  { %v830_v1 = vsel %vm313_vm8, %v675_v20, %v2201_v27  ;;  %v829_v3 = vsel %vm313_vm8, %v654_v18, %v2200_v59  ;;  %v914_v27 = vperm.slane %v2813_v13, 2 }
 0x537   :  { %v2204_v16 = vpop.permute.xlu2 %2203 }
 0x538   :  { %v2206_v62 = vunpack.i.h.bf16 %v2204_v16  ;;  %v2205_v63 = vunpack.i.l.bf16 %v2204_v16 }
 0x53a   :  { %v833_v6 = vsel %vm831_vm12, %v830_v1, %v2206_v62  ;;  %v832_v7 = vsel %vm831_vm12, %v829_v3, %v2205_v63 }
 0x543   :  { %v2209_v0 = vpop.permute.xlu1 %2208 }
 0x544   :  { %v2211_v4 = vunpack.i.h.bf16 %v2209_v0  ;;  %v2210_v5 = vunpack.i.l.bf16 %v2209_v0  ;;  %v917_v0 = vperm.slane %v2813_v13, 3 }
 0x546   :  { %v835_v11 = vsel %vm834_vm13, %v832_v7, %v2210_v5  ;;  %v836_v9 = vsel %vm834_vm13, %v833_v6, %v2211_v4 }
 0x547   :  { %v837_v12 = vpack.c.bf16 %v836_v9, %v835_v11  ;;  %v2163_v11 = vld [vmem:[%s3079_s9 + $0x18] sm:$0xff]  ;;  %v2162_v9 = vld [vmem:[%s3079_s9 + $0x10] sm:$0xff] }
 0x548   :  { %1005 = vmatpush.bf16.msra.mxu3 %v2163_v11 }
 0x549   :  { %2027 = vmatmul.msk.bf16.vlgmr.msra.gmra.mxu1 %vm146_vm0, %v837_v12  ;;  %v2161_v12 = vld [vmem:[%s3079_s9 + $0x8] sm:$0xff] }
 0x54c   :  { %1006 = vmatpush.bf16.msra.mxu3 %v2162_v9 }
 0x550   :  { %1007 = vmatpush.bf16.msra.mxu3 %v2161_v12 }
 0x5c6   :  { %v863_v17 = vpop.f32.mrf.mxu1 }
 0x5c7   :  { %v864_v18 = vadd.f32 %v863_v17, %v838_v15 }
 0x5c9   :  { %v868_v20 = vadd.f32 %v864_v18, %v2649_v49  ;;  %v2160_v18 = vld [vmem:[%s3079_s9] sm:$0xff] }
 0x5ca   :  { %1008 = vmatpush.bf16.msra.mxu3 %v2160_v18 }
 0x5cb   :  { %v870_v21 = vsel %vm146_vm0, %v868_v20, 0.0 }
 0x5cc   :  { %871 = vadd.xlane.f32.xlu0 %v870_v21 }
 0x5ce   :  { %v865_v24 = vpop.f32.mrf.mxu1 }
 0x5cf   :  { %v866_v23 = vadd.f32 %v865_v24, %v838_v15  ;;  %v2230_v15 = vld [vmem:[#allocation8] ss:$0 sm:$0xff] }
 0x5d1   :  { %v869_v25 = vadd.f32 %v866_v23, %v2651_v50  ;;  %v2159_v50 = vld [vmem:[%s3077_s7 + $0x8] sm:$0xff] }
 0x5d2   :  { %945 = vmatpush.bf16.msra.mxu2 %v2159_v50 }
 0x5d3   :  { %v873_v14 = vsel %vm146_vm0, %v869_v25, 0.0 }
 0x5d4   :  { %874 = vadd.xlane.f32.xlu2 %v873_v14 }
 0x5d6   :  { %946 = vmatpush.bf16.msra.mxu2 %v2158_v41 }
 0x63f   :  { %v872_v28 = vpop.xlane.xlu0 %871 }
 0x640   :  { %v876_v26 = vmul.f32 %v872_v28, %v2635_v10 }
 0x642   :  { %v878_v29 = vsub.f32 %v868_v20, %v876_v26 }
 0x644   :  { %v880_v32 = vmul.f32 %v878_v29, %v878_v29 }
 0x646   :  { %v882_v33 = vsel %vm146_vm0, %v880_v32, 0.0 }
 0x647   :  { %v875_v34 = vpop.xlane.xlu2 %874  ;;  %883 = vadd.xlane.f32.xlu1 %v882_v33 }
 0x648   :  { %v877_v49 = vmul.f32 %v875_v34, %v2635_v10 }
 0x64a   :  { %v879_v35 = vsub.f32 %v869_v25, %v877_v49 }
 0x64c   :  { %v881_v36 = vmul.f32 %v879_v35, %v879_v35 }
 0x64e   :  { %v885_v37 = vsel %vm146_vm0, %v881_v36, 0.0 }
 0x64f   :  { %886 = vadd.xlane.f32.xlu0 %v885_v37 }
 0x6ba   :  { %v884_v38 = vpop.xlane.xlu1 %883 }
 0x6bb   :  { %v888_v39 = vmul.f32 %v884_v38, %v2635_v10 }
 0x6bd   :  { %v890_v40 = vadd.f32 1e-12, %v888_v39 }
 0x6bf   :  { %2273 = vrsqrt.f32 %v890_v40  ;;  %vm898_vm15 = vweird.f32 %v890_v40 }
 0x6c2   :  { %v887_v42 = vpop.xlane.xlu0 %886 }
 0x6c3   :  { %v889_v43 = vmul.f32 %v887_v42, %v2635_v10 }
 0x6c5   :  { %v2274_v44 = vpop.eup %2273  ;;  %v891_v45 = vadd.f32 1e-12, %v889_v43  ;;  %v972_v43 = vperm.slane %v2813_v13, 1 }
 0x6c6   :  { %v893_v46 = vmul.f32 %v2274_v44, %v890_v40  ;;  %vm899_vm14 = vweird.f32 %v2274_v44 }
 0x6c7   :  { %2275 = vrsqrt.f32 %v891_v45  ;;  %vm900_vm1 = vmor %vm898_vm15, %vm899_vm14  ;;  %vm908_vm3 = vweird.f32 %v891_v45 }
 0x6c8   :  { %v894_v47 = vmul.f32 %v2274_v44, %v893_v46 }
 0x6ca   :  { %v895_v22 = vmul.f32 0.5, %v894_v47 }
 0x6cc   :  { %v896_v48 = vsub.f32 1.5, %v895_v22 }
 0x6cd   :  { %v2276_v51 = vpop.eup %2275 }
 0x6ce   :  { %v897_v52 = vmul.f32 %v2274_v44, %v896_v48  ;;  %v903_v53 = vmul.f32 %v2276_v51, %v891_v45  ;;  %vm909_vm2 = vweird.f32 %v2276_v51 }
 0x6cf   :  { %vm910_vm4 = vmor %vm908_vm3, %vm909_vm2 }
 0x6d0   :  { %v904_v55 = vmul.f32 %v2276_v51, %v903_v53  ;;  %v901_v56 = vsel %vm900_vm1, %v2274_v44, %v897_v52 }
 0x6d1   :  { %v912_v59 = vmul.f32 %v901_v56, %v878_v29 }
 0x6d2   :  { %v905_v57 = vmul.f32 0.5, %v904_v55 }
 0x6d3   :  { %v915_v1 = vmul.f32 %v914_v27, %v912_v59 }
 0x6d4   :  { %v906_v16 = vsub.f32 1.5, %v905_v57 }
 0x6d5   :  { %v918_v5 = vadd.f32 %v917_v0, %v915_v1  ;;  %v2165_v1 = vld [vmem:[%s3074_s4 + $0x18] sm:$0xff] }
 0x6d6   :  { %v907_v62 = vmul.f32 %v2276_v51, %v906_v16  ;;  %1122 = vmatpush.bf16.msrb.mxu0 %v2165_v1 }
 0x6d8   :  { %v911_v63 = vsel %vm910_vm4, %v2276_v51, %v907_v62 }
 0x6d9   :  { %v913_v3 = vmul.f32 %v911_v63, %v879_v35 }
 0x6db   :  { %v916_v4 = vmul.f32 %v914_v27, %v913_v3 }
 0x6dd   :  { %v919_v6 = vadd.f32 %v917_v0, %v916_v4 }
 0x6df   :  { %v920_v7 = vpack.c.bf16 %v919_v6, %v918_v5 }
 0x6e1   :  { %2036 = vmatmul.msk.bf16.vlgmr.msra.gmra.mxu2 %vm146_vm0, %v920_v7 }
 0x764   :  { %v948_v17 = vpop.f32.mrf.mxu2 }
 0x765   :  { %v949_v20 = vadd.f32 %v2230_v15, %v948_v17 }
 0x767   :  { %v953_v21 = vmul.f32 %v949_v20, %v949_v20 }
 0x769   :  { %v955_v24 = vmul.f32 %v953_v21, %v949_v20 }
 0x76b   :  { %v957_v23 = vmul.f32 0.044715, %v955_v24 }
 0x76c   :  { %v950_v25 = vpop.f32.mrf.mxu2 }
 0x76d   :  { %v959_v14 = vadd.f32 %v957_v23, %v949_v20  ;;  %v951_v28 = vadd.f32 %v2230_v15, %v950_v25 }
 0x76f   :  { %v961_v26 = vmul.f32 0.7978846, %v959_v14  ;;  %v954_v29 = vmul.f32 %v951_v28, %v951_v28 }
 0x771   :  { %v956_v32 = vmul.f32 %v954_v29, %v951_v28  ;;  %2277 = vtanh.f32 %v961_v26  ;;  %v1061_v29 = vperm.slane %v2813_v13, 4 }
 0x773   :  { %v958_v33 = vmul.f32 0.044715, %v956_v32 }
 0x775   :  { %v960_v34 = vadd.f32 %v958_v33, %v951_v28 }
 0x777   :  { %v962_v49 = vmul.f32 0.7978846, %v960_v34  ;;  %v2278_v35 = vpop.eup %2277 }
 0x778   :  { %v965_v36 = vadd.f32 1.0, %v2278_v35 }
 0x779   :  { %2279 = vtanh.f32 %v962_v49  ;;  %v1064_v49 = vperm.slane %v2813_v13, 5 }
 0x77a   :  { %v967_v50 = vmul.f32 0.5, %v965_v36 }
 0x77c   :  { %v969_v40 = vmul.f32 %v967_v50, %v949_v20 }
 0x77f   :  { %v2280_v37 = vpop.eup %2279 }
 0x780   :  { %v966_v38 = vadd.f32 1.0, %v2280_v37 }
 0x782   :  { %v968_v39 = vmul.f32 0.5, %v966_v38 }
 0x784   :  { %v970_v41 = vmul.f32 %v968_v39, %v951_v28 }
 0x786   :  { %v971_v42 = vpack.c.bf16 %v970_v41, %v969_v40  ;;  %v2231_v40 = vld [vmem:[%s3075_s5 + $0x1] ss:$0 sm:$0xff] }
 0x788   :  { %2053 = vmatmul.msk.bf16.vlgmr.msra.gmra.mxu3 %vm997_vm5, %v971_v42 }
 0x80b   :  { %v1010_v44 = vpop.f32.mrf.mxu3 }
 0x80c   :  { %v1011_v45 = vadd.f32 %v1010_v44, %v972_v43 }
 0x80e   :  { %v1015_v46 = vadd.f32 %v1011_v45, %v918_v5 }
 0x810   :  { %v1017_v47 = vsel %vm146_vm0, %v1015_v46, 0.0 }
 0x811   :  { %1018 = vadd.xlane.f32.xlu2 %v1017_v47 }
 0x813   :  { %v1012_v22 = vpop.f32.mrf.mxu3 }
 0x814   :  { %v1013_v48 = vadd.f32 %v1012_v22, %v972_v43 }
 0x816   :  { %v1016_v51 = vadd.f32 %v1013_v48, %v919_v6  ;;  %v2164_v6 = vld [vmem:[%s3074_s4 + $0x10] sm:$0xff]  ;;  %s1981_s4 = sshll.u32 %s3085_s15, 4  ;;  %s1982_s4 = int_to_ptr.hbm [resolvable:$true] %s1981_s4 }
 0x817   :  { %1123 = vmatpush.bf16.msrb.mxu0 %v2164_v6 }
 0x818   :  { %v1020_v52 = vsel %vm146_vm0, %v1016_v51, 0.0 }
 0x819   :  { %1021 = vadd.xlane.f32.xlu1 %v1020_v52 }
 0x884   :  { %v1019_v53 = vpop.xlane.xlu2 %1018 }
 0x885   :  { %v1023_v55 = vmul.f32 %v1019_v53, %v2635_v10 }
 0x887   :  { %v1025_v56 = vsub.f32 %v1015_v46, %v1023_v55 }
 0x889   :  { %v1027_v57 = vmul.f32 %v1025_v56, %v1025_v56 }
 0x88b   :  { %v1029_v16 = vsel %vm146_vm0, %v1027_v57, 0.0 }
 0x88c   :  { %v1022_v27 = vpop.xlane.xlu1 %1021  ;;  %1030 = vadd.xlane.f32.xlu0 %v1029_v16 }
 0x88d   :  { %v1024_v59 = vmul.f32 %v1022_v27, %v2635_v10 }
 0x88f   :  { %v1026_v62 = vsub.f32 %v1016_v51, %v1024_v59 }
 0x891   :  { %v1028_v63 = vmul.f32 %v1026_v62, %v1026_v62 }
 0x893   :  { %v1032_v0 = vsel %vm146_vm0, %v1028_v63, 0.0 }
 0x894   :  { %1033 = vadd.xlane.f32.xlu2 %v1032_v0 }
 0x8ff   :  { %v1031_v3 = vpop.xlane.xlu0 %1030 }
 0x900   :  { %v1035_v4 = vmul.f32 %v1031_v3, %v2635_v10 }
 0x902   :  { %v1037_v5 = vadd.f32 1e-12, %v1035_v4 }
 0x904   :  { %2281 = vrsqrt.f32 %v1037_v5  ;;  %vm1045_vm7 = vweird.f32 %v1037_v5 }
 0x907   :  { %v1034_v7 = vpop.xlane.xlu2 %1033 }
 0x908   :  { %v1036_v11 = vmul.f32 %v1034_v7, %v2635_v10 }
 0x90a   :  { %v2282_v9 = vpop.eup %2281  ;;  %v1038_v12 = vadd.f32 1e-12, %v1036_v11 }
 0x90b   :  { %v1040_v15 = vmul.f32 %v2282_v9, %v1037_v5  ;;  %vm1046_vm6 = vweird.f32 %v2282_v9 }
 0x90c   :  { %2283 = vrsqrt.f32 %v1038_v12  ;;  %vm1047_vm10 = vmor %vm1045_vm7, %vm1046_vm6  ;;  %vm1055_vm14 = vweird.f32 %v1038_v12 }
 0x90d   :  { %v1041_v17 = vmul.f32 %v2282_v9, %v1040_v15 }
 0x90f   :  { %v1042_v18 = vmul.f32 0.5, %v1041_v17 }
 0x911   :  { %v1043_v20 = vsub.f32 1.5, %v1042_v18 }
 0x912   :  { %v2284_v21 = vpop.eup %2283 }
 0x913   :  { %v1044_v24 = vmul.f32 %v2282_v9, %v1043_v20  ;;  %v1050_v23 = vmul.f32 %v2284_v21, %v1038_v12  ;;  %vm1056_vm11 = vweird.f32 %v2284_v21 }
 0x914   :  { %vm1057_vm15 = vmor %vm1055_vm14, %vm1056_vm11  ;;  %vm1904_vm11 = vcmask 1041409  }
 0x915   :  { %v1051_v25 = vmul.f32 %v2284_v21, %v1050_v23  ;;  %v1048_v14 = vsel %vm1047_vm10, %v2282_v9, %v1044_v24 }
 0x916   :  { %v1059_v32 = vmul.f32 %v1048_v14, %v1025_v56 }
 0x917   :  { %v1052_v28 = vmul.f32 0.5, %v1051_v25 }
 0x918   :  { %v1062_v35 = vmul.f32 %v1061_v29, %v1059_v32 }
 0x919   :  { %v1053_v26 = vsub.f32 1.5, %v1052_v28 }
 0x91a   :  { %v2865_v50 = vadd.f32 %v1064_v49, %v1062_v35 }
 0x91b   :  { %v1054_v33 = vmul.f32 %v2284_v21, %v1053_v26 }
 0x91d   :  { %v1058_v34 = vsel %vm1057_vm15, %v2284_v21, %v1054_v33 }
 0x91e   :  { %v1060_v36 = vmul.f32 %v1058_v34, %v1026_v62 }
 0x920   :  { %v1063_v37 = vmul.f32 %v1061_v29, %v1060_v36 }
 0x922   :  { %v2867_v38 = vadd.f32 %v1064_v49, %v1063_v37 }
 0x924   :  { %v1097_v39 = vpack.c.bf16 %v2867_v38, %v2865_v50 }
 0x926   :  { %2084 = vmatmul.msk.bf16.vlgmr.msrb.gmra.mxu0 %vm146_vm0, %v1097_v39 }
 0x9a3   :  { %v1125_v41 = vpop.f32.mrf.mxu0 }
 0x9a4   :  { %v1126_v42 = vadd.f32 %v2231_v40, %v1125_v41 }
 0x9a6   :  { %1132 = vrot.lane.b32.xlu1 %v1126_v42, %s2523_s25  ;;  %v1150_v45 = vpack.c.bf16 %v1126_v42, %v1126_v42 }
 0x9a8   :  { %v1159_v47 = vunpack.c.l.b16 %v1150_v45 }
 0x9aa   :  { %v2883_v48 = vpack.c.b16 %v1159_v47, %v1159_v47 }
 0x9ab   :  { %v1127_v13 = vpop.f32.mrf.mxu0 }
 0x9ac   :  { %v1128_v43 = vadd.f32 %v2231_v40, %v1127_v13 }
 0x9ae   :  { %1140 = vrot.lane.b32.xlu2 %v1128_v43, %s2524_s26  ;;  %1134 = vrot.lane.b32.xlu0 %v1128_v43, %s2523_s25  ;;  %v1151_v44 = vpack.c.bf16 %v1128_v43, %v1128_v43 }
 0x9af   :  { %1138 = vrot.lane.b32.xlu1 %v1126_v42, %s2524_s26 }
 0x9b0   :  { %v1183_v46 = vunpack.c.l.b16 %v1151_v44 }
 0x9b2   :  { %v2881_v22 = vpack.c.b16 %v1183_v46, %v1183_v46 }
 0x9b6   :  { %1146 = vrot.lane.b32.xlu2 %v1128_v43, %s2522_s24  ;;  %1144 = vrot.lane.b32.xlu0 %v1126_v42, %s2522_s24 }
 0x9be   :  { %1185 = vrot.lane.b32.xlu0 %v2881_v22, %s2525_s27  ;;  %1161 = vrot.lane.b32.xlu2 %v2883_v48, %s2525_s27 }
 0xa08   :  { %v1141_v51 = vpop.permute.xlu2 %1140 }
 0xa09   :  { %v1155_v27 = vpack.c.bf16 %v1141_v51, %v1141_v51 }
 0xa0b   :  { %v1279_v63 = vunpack.c.l.b16 %v1155_v27 }
 0xa0d   :  { %v2895_v4 = vpack.c.b16 %v1279_v63, %v1279_v63 }
 0xa10   :  { %v1147_v52 = vpop.permute.xlu2 %1146 }
 0xa11   :  { %v1157_v5 = vpack.c.bf16 %v1147_v52, %v1147_v52 }
 0xa13   :  { %v1327_v9 = vunpack.c.l.b16 %v1157_v5 }
 0xa15   :  { %v2903_v18 = vpack.c.b16 %v1327_v9, %v1327_v9 }
 0xa18   :  { %v1133_v53 = vpop.permute.xlu1 %1132  ;;  %v1162_v55 = vpop.permute.xlu2 %1161 }
 0xa19   :  { %v1152_v56 = vpack.c.bf16 %v1133_v53, %v1133_v53  ;;  %v1167_v57 = vsel %vm313_vm8, %v1162_v55, 0 }
 0xa1a   :  { %1176 = vmatpush.bf16.xpose.msrb.mxu1 %v1167_v57 }
 0xa1b   :  { %v1207_v16 = vunpack.c.l.b16 %v1152_v56 }
 0xa1d   :  { %v2890_v59 = vpack.c.b16 %v1207_v16, %v1207_v16 }
 0xa1f   :  { %1209 = vrot.lane.b32.xlu1 %v2890_v59, %s2525_s27 }
 0xa20   :  { %v1135_v62 = vpop.permute.xlu0 %1134 }
 0xa21   :  { %v1153_v0 = vpack.c.bf16 %v1135_v62, %v1135_v62  ;;  %2085 = vmatmul.msk.bf16.vlgmr.msrb.gmra.mxu1 %vm313_vm8, %v1150_v45  ;;  %v1139_v1 = vpop.permute.xlu1 %1138 }
 0xa22   :  { %v1154_v7 = vpack.c.bf16 %v1139_v1, %v1139_v1 }
 0xa23   :  { %v1231_v3 = vunpack.c.l.b16 %v1153_v0 }
 0xa24   :  { %v1255_v12 = vunpack.c.l.b16 %v1154_v7 }
 0xa25   :  { %v2897_v6 = vpack.c.b16 %v1231_v3, %v1231_v3 }
 0xa26   :  { %v2905_v20 = vpack.c.b16 %v1255_v12, %v1255_v12 }
 0xa27   :  { %1233 = vrot.lane.b32.xlu0 %v2897_v6, %s2525_s27  ;;  %1281 = vrot.lane.b32.xlu1 %v2895_v4, %s2525_s27 }
 0xa28   :  { %v1145_v11 = vpop.permute.xlu0 %1144 }
 0xa29   :  { %v1156_v15 = vpack.c.bf16 %v1145_v11, %v1145_v11 }
 0xa2b   :  { %v1303_v17 = vunpack.c.l.b16 %v1156_v15 }
 0xa2d   :  { %v2907_v21 = vpack.c.b16 %v1303_v17, %v1303_v17 }
 0xa2f   :  { %1329 = vrot.lane.b32.xlu1 %v2903_v18, %s2525_s27  ;;  %1257 = vrot.lane.b32.xlu0 %v2905_v20, %s2525_s27 }
 0xa30   :  { %1305 = vrot.lane.b32.xlu2 %v2907_v21, %s2525_s27  ;;  %v1186_v24 = vpop.permute.xlu0 %1185 }
 0xa31   :  { %v1191_v23 = vsel %vm313_vm8, %v1186_v24, 0 }
 0xa32   :  { %1200 = vmatpush.bf16.xpose.msrb.mxu2 %v1191_v23 }
 0xa39   :  { %2086 = vmatmul.msk.bf16.vlgmr.msrb.gmra.mxu2 %vm313_vm8, %v1151_v44 }
 0xa8a   :  { %v1306_v25 = vpop.permute.xlu2 %1305 }
 0xa8b   :  { %v1311_v26 = vsel %vm313_vm8, %v1306_v25, 0 }
 0xa91   :  { %v1210_v14 = vpop.permute.xlu1 %1209 }
 0xa92   :  { %v1215_v28 = vsel %vm313_vm8, %v1210_v14, 0 }
 0xa93   :  { %1224 = vmatpush.bf16.xpose.msrb.mxu3 %v1215_v28 }
 0xa99   :  { %v1234_v29 = vpop.permute.xlu0 %1233  ;;  %v1282_v32 = vpop.permute.xlu1 %1281 }
 0xa9a   :  { %v1239_v33 = vsel %vm313_vm8, %v1234_v29, 0  ;;  %v1287_v34 = vsel %vm313_vm8, %v1282_v32, 0  ;;  %2087 = vmatmul.msk.bf16.vlgmr.msrb.gmra.mxu3 %vm313_vm8, %v1152_v56 }
 0xa9b   :  { %1320 = vmatpush.bf16.xpose.msra.mxu3 %v1311_v26  ;;  %1248 = vmatpush.bf16.xpose.msra.mxu0 %v1239_v33 }
 0xa9c   :  { %1296 = vmatpush.bf16.xpose.msra.mxu2 %v1287_v34 }
 0xa9e   :  { %v1178_v49 = vpop.f32.mrf.mxu1 }
 0xa9f   :  { %v1350_v35 = vmul.f32 0.35355338, %v1178_v49 }
 0xaa1   :  { %v1258_v36 = vpop.permute.xlu0 %1257  ;;  %v1330_v37 = vpop.permute.xlu1 %1329  ;;  %v1358_v39 = vadd.f32 %v1350_v35, %v517_v61 }
 0xaa2   :  { %v1263_v40 = vsel %vm313_vm8, %v1258_v36, 0  ;;  %v1335_v41 = vsel %vm313_vm8, %v1330_v37, 0  ;;  %2088 = vmatmul.msk.bf16.vlgmr.msra.gmra.mxu0 %vm313_vm8, %v1153_v0 }
 0xaa3   :  { %2090 = vmatmul.msk.bf16.vlgmr.msra.gmra.mxu2 %vm313_vm8, %v1155_v27  ;;  %1272 = vmatpush.bf16.xpose.msra.mxu1 %v1263_v40  ;;  %v1366_v42 = vsel %vm313_vm8, %v1358_v39, -inf }
 0xaa4   :  { %1344 = vmatpush.bf16.xpose.msrb.mxu0 %v1335_v41  ;;  %1367 = vmax.xlane.f32.xlu1 %v1366_v42 }
 0xaa6   :  { %v1180_v13 = vpop.f32.mrf.mxu1 }
 0xaaa   :  { %2089 = vmatmul.msk.bf16.vlgmr.msra.gmra.mxu1 %vm313_vm8, %v1154_v7  ;;  %2091 = vmatmul.msk.bf16.vlgmr.msra.gmra.mxu3 %vm313_vm8, %v1156_v15 }
 0xab2   :  { %2092 = vmatmul.msk.bf16.vlgmr.msrb.gmra.mxu0 %vm313_vm8, %v1157_v5 }
 0xabc   :  { %v1202_v54 = vpop.f32.mrf.mxu2 }
 0xabd   :  { %v1351_v61 = vmul.f32 0.35355338, %v1202_v54  ;;  %1462 = vrot.lane.b32.xlu1 %v2883_v48, %s2518_s17 }
 0xabf   :  { %v1359_v43 = vadd.f32 %v1351_v61, %v2717_v58 }
 0xac1   :  { %v1369_v44 = vsel %vm313_vm8, %v1359_v43, -inf }
 0xac2   :  { %1370 = vmax.xlane.f32.xlu2 %v1369_v44 }
 0xac4   :  { %v1204_v45 = vpop.f32.mrf.mxu2 }
 0xb17   :  { %v1368_v57 = vpop.xlane.xlu1 %1367 }
 0xb1d   :  { %v1226_v46 = vpop.f32.mrf.mxu3 }
 0xb1e   :  { %v1352_v47 = vmul.f32 0.35355338, %v1226_v46 }
 0xb1f   :  { %v1250_v51 = vpop.f32.mrf.mxu0 }
 0xb20   :  { %v1360_v52 = vadd.f32 %v1352_v47, %v2726_v8  ;;  %v1353_v62 = vmul.f32 0.35355338, %v1250_v51 }
 0xb22   :  { %v1372_v53 = vsel %vm313_vm8, %v1360_v52, -inf  ;;  %v1361_v12 = vadd.f32 %v1353_v62, %v2742_v31  ;;  %v1390_v31 = vsub.f32 %v1358_v39, %v1368_v57 }
 0xb23   :  { %1373 = vmax.xlane.f32.xlu0 %v1372_v53 }
 0xb24   :  { %v1398_v26 = vmul.f32 1.442695, %v1390_v31 }
 0xb25   :  { %v1228_v55 = vpop.f32.mrf.mxu3 }
 0xb26   :  { %v1298_v56 = vpop.f32.mrf.mxu2 }
 0xb27   :  { %v1252_v16 = vpop.f32.mrf.mxu0  ;;  %v1274_v27 = vpop.f32.mrf.mxu1  ;;  %v1355_v32 = vmul.f32 0.35355338, %v1298_v56 }
 0xb28   :  { %v1354_v48 = vmul.f32 0.35355338, %v1274_v27 }
 0xb2a   :  { %v1362_v58 = vadd.f32 %v1354_v48, %v2734_v19  ;;  %v1375_v19 = vsel %vm313_vm8, %v1361_v12, -inf }
 0xb2c   :  { %v1378_v63 = vsel %vm313_vm8, %v1362_v58, -inf }
 0xb2d   :  { %1379 = vmax.xlane.f32.xlu2 %v1378_v63  ;;  %v1322_v1 = vpop.f32.mrf.mxu3 }
 0xb2e   :  { %v1300_v0 = vpop.f32.mrf.mxu2  ;;  %v1356_v3 = vmul.f32 0.35355338, %v1322_v1 }
 0xb2f   :  { %v1346_v5 = vpop.f32.mrf.mxu0  ;;  %v1463_v8 = vpop.permute.xlu1 %1462 }
 0xb30   :  { %v1468_v7 = vsel %vm220_vm9, %v1463_v8, 0  ;;  %v1276_v11 = vpop.f32.mrf.mxu1  ;;  %v1364_v9 = vadd.f32 %v1356_v3, %v2740_v30  ;;  %v1357_v34 = vmul.f32 0.35355338, %v1346_v5 }
 0xb31   :  { %1477 = vmatpush.bf16.msrb.mxu1 %v1468_v7 }
 0xb32   :  { %v1384_v15 = vsel %vm313_vm8, %v1364_v9, -inf  ;;  %v1365_v35 = vadd.f32 %v1357_v34, %v2758_v2 }
 0xb33   :  { %1385 = vmax.xlane.f32.xlu1 %v1384_v15 }
 0xb34   :  { %v1387_v36 = vsel %vm313_vm8, %v1365_v35, -inf }
 0xb35   :  { %1376 = vmax.xlane.f32.xlu2 %v1375_v19  ;;  %v1324_v17 = vpop.f32.mrf.mxu3  ;;  %v1371_v24 = vpop.xlane.xlu2 %1370 }
 0xb36   :  { %v1391_v23 = vsub.f32 %v1359_v43, %v1371_v24 }
 0xb37   :  { %1504 = vrot.lane.b32.xlu0 %v2890_v59, %s2518_s17  ;;  %v1348_v25 = vpop.f32.mrf.mxu0  ;;  %v1363_v59 = vadd.f32 %v1355_v32, %v2751_v60 }
 0xb38   :  { %v1400_v14 = vmul.f32 1.442695, %v1391_v23 }
 0xb39   :  { %v1381_v49 = vsel %vm313_vm8, %v1363_v59, -inf }
 0xb3a   :  { %2285 = vpow2.f32 %v1400_v14 }
 0xb3b   :  { %2287 = vpow2.f32 %v1398_v26 }
 0xb40   :  { %v2286_v28 = vpop.eup %2285 }
 0xb41   :  { %v1417_v30 = vsel %vm313_vm8, %v2286_v28, 0.0  ;;  %v2288_v29 = vpop.eup %2287 }
 0xb42   :  { %1418 = vadd.xlane.f32.xlu1 %v1417_v30  ;;  %v1414_v33 = vsel %vm313_vm8, %v2288_v29, 0.0 }
 0xb4d   :  { %1483 = vrot.lane.b32.xlu2 %v2881_v22, %s2518_s17 }
 0xb61   :  { %1415 = vadd.xlane.f32.xlu0 %v1414_v33 }
 0xb69   :  { %1382 = vmax.xlane.f32.xlu0 %v1381_v49 }
 0xb71   :  { %1388 = vmax.xlane.f32.xlu0 %v1387_v36 }
 0xb85   :  { %1525 = vrot.lane.b32.xlu0 %v2897_v6, %s2518_s17 }
 0xb96   :  { %v1374_v22 = vpop.xlane.xlu0 %1373 }
 0xb97   :  { %v1392_v37 = vsub.f32 %v1360_v52, %v1374_v22 }
 0xb99   :  { %v1402_v39 = vmul.f32 1.442695, %v1392_v37 }
 0xb9b   :  { %2289 = vpow2.f32 %v1402_v39 }
 0xba0   :  { %v1380_v40 = vpop.xlane.xlu2 %1379 }
 0xba1   :  { %v2957_v41 = vpop.eup %2289  ;;  %v1394_v60 = vsub.f32 %v1362_v58, %v1380_v40 }
 0xba2   :  { %v1420_v42 = vsel %vm313_vm8, %v2957_v41, 0.0 }
 0xba3   :  { %v1406_v13 = vmul.f32 1.442695, %v1394_v60  ;;  %1421 = vadd.xlane.f32.xlu2 %v1420_v42 }
 0xba5   :  { %2291 = vpow2.f32 %v1406_v13 }
 0xba6   :  { %v1386_v2 = vpop.xlane.xlu1 %1385 }
 0xba7   :  { %v1396_v54 = vsub.f32 %v1364_v9, %v1386_v2 }
 0xba8   :  { %v1377_v61 = vpop.xlane.xlu2 %1376 }
 0xba9   :  { %v1410_v43 = vmul.f32 1.442695, %v1396_v54  ;;  %v1393_v44 = vsub.f32 %v1361_v12, %v1377_v61  ;;  %v1505_v6 = vpop.permute.xlu0 %1504 }
 0xbaa   :  { %v1510_v45 = vsel %vm220_vm9, %v1505_v6, 0 }
 0xbab   :  { %v2962_v46 = vpop.eup %2291  ;;  %2293 = vpow2.f32 %v1410_v43  ;;  %v1404_v47 = vmul.f32 1.442695, %v1393_v44  ;;  %1519 = vmatpush.bf16.msrb.mxu3 %v1510_v45 }
 0xbac   :  { %v1426_v51 = vsel %vm313_vm8, %v2962_v46, 0.0 }
 0xbad   :  { %2295 = vpow2.f32 %v1404_v47  ;;  %1427 = vadd.xlane.f32.xlu1 %v1426_v51 }
 0xbb0   :  { %v1484_v52 = vpop.permute.xlu2 %1483 }
 0xbb1   :  { %v2294_v53 = vpop.eup %2293  ;;  %v1489_v55 = vsel %vm220_vm9, %v1484_v52, 0 }
 0xbb2   :  { %1498 = vmatpush.bf16.msrb.mxu2 %v1489_v55  ;;  %v1432_v56 = vsel %vm313_vm8, %v2294_v53, 0.0 }
 0xbb3   :  { %v2296_v57 = vpop.eup %2295  ;;  %1433 = vadd.xlane.f32.xlu0 %v1432_v56 }
 0xbb4   :  { %v1423_v16 = vsel %vm313_vm8, %v2296_v57, 0.0 }
 0xbb5   :  { %v1419_v27 = vpop.xlane.xlu1 %1418  ;;  %1424 = vadd.xlane.f32.xlu1 %v1423_v16 }
 0xbb6   :  { %2297 = vrcp.f32 %v1419_v27 }
 0xbbc   :  { %v2298_v48 = vpop.eup %2297 }
 0xbbd   :  { %v1447_v58 = vmul.f32 %v2298_v48, %v2286_v28 }
 0xbbf   :  { %v1455_v62 = vpack.c.bf16 %v1447_v58, %v1447_v58 }
 0xbc1   :  { %2094 = vmatmul.msk.bf16.vlgmr.msrb.gmra.mxu2 %vm313_vm8, %v1455_v62 }
 0xbc7   :  { %1588 = vrot.lane.b32.xlu0 %v2907_v21, %s2518_s17 }
 0xbce   :  { %1546 = vrot.lane.b32.xlu1 %v2905_v20, %s2518_s17 }
 0xbcf   :  { %1609 = vrot.lane.b32.xlu0 %v2903_v18, %s2518_s17 }
 0xbd4   :  { %v1416_v63 = vpop.xlane.xlu0 %1415 }
 0xbd5   :  { %2299 = vrcp.f32 %v1416_v63 }
 0xbdb   :  { %v2300_v0 = vpop.eup %2299 }
 0xbdc   :  { %v1446_v1 = vmul.f32 %v2300_v0, %v2288_v29  ;;  %v1383_v3 = vpop.xlane.xlu0 %1382 }
 0xbdd   :  { %v1395_v5 = vsub.f32 %v1363_v59, %v1383_v3 }
 0xbde   :  { %v1454_v8 = vpack.c.bf16 %v1446_v1, %v1446_v1 }
 0xbdf   :  { %v1408_v7 = vmul.f32 1.442695, %v1395_v5 }
 0xbe0   :  { %2093 = vmatmul.msk.bf16.vlgmr.msrb.gmra.mxu1 %vm313_vm8, %v1454_v8 }
 0xbe1   :  { %2301 = vpow2.f32 %v1408_v7  ;;  %v2167_v7 = vld [vmem:[%s3076_s6 + $0x18] sm:$0xff] }
 0xbe4   :  { %v1389_v11 = vpop.xlane.xlu0 %1388 }
 0xbe5   :  { %v1397_v9 = vsub.f32 %v1365_v35, %v1389_v11  ;;  %v2166_v11 = vld [vmem:[%s3076_s6 + $0x10] sm:$0xff] }
 0xbe7   :  { %v2302_v21 = vpop.eup %2301  ;;  %v1412_v12 = vmul.f32 1.442695, %v1397_v9 }
 0xbe8   :  { %v1429_v20 = vsel %vm313_vm8, %v2302_v21, 0.0 }
 0xbe9   :  { %2303 = vpow2.f32 %v1412_v12  ;;  %1430 = vadd.xlane.f32.xlu2 %v1429_v20 }
 0xbef   :  { %v2304_v18 = vpop.eup %2303 }
 0xbf0   :  { %v1435_v15 = vsel %vm313_vm8, %v2304_v18, 0.0 }
 0xbf1   :  { %1436 = vadd.xlane.f32.xlu2 %v1435_v15 }
 0xbf7   :  { %v1526_v19 = vpop.permute.xlu0 %1525 }
 0xbf8   :  { %v1531_v17 = vsel %vm220_vm9, %v1526_v19, 0 }
 0xbf9   :  { %1540 = vmatpush.bf16.msra.mxu0 %v1531_v17 }
 0xc09   :  { %1567 = vrot.lane.b32.xlu2 %v2895_v4, %s2518_s17 }
 0xc16   :  { %v1422_v24 = vpop.xlane.xlu2 %1421 }
 0xc17   :  { %2305 = vrcp.f32 %v1422_v24 }
 0xc1d   :  { %v2306_v23 = vpop.eup %2305 }
 0xc1e   :  { %v1448_v25 = vmul.f32 %v2306_v23, %v2957_v41 }
 0xc20   :  { %v1456_v14 = vpack.c.bf16 %v1448_v25, %v1448_v25  ;;  %v1428_v28 = vpop.xlane.xlu1 %1427 }
 0xc22   :  { %2095 = vmatmul.msk.bf16.vlgmr.msrb.gmra.mxu3 %vm313_vm8, %v1456_v14 }
 0xc26   :  { %v1434_v31 = vpop.xlane.xlu0 %1433 }
 0xc28   :  { %v1425_v30 = vpop.xlane.xlu1 %1424 }
 0xc29   :  { %2307 = vrcp.f32 %v1425_v30 }
 0xc2a   :  { %2309 = vrcp.f32 %v1434_v31 }
 0xc2b   :  { %2311 = vrcp.f32 %v1428_v28 }
 0xc2f   :  { %v2308_v26 = vpop.eup %2307 }
 0xc30   :  { %v1449_v29 = vmul.f32 %v2308_v26, %v2296_v57  ;;  %v2310_v33 = vpop.eup %2309 }
 0xc31   :  { %v1452_v4 = vmul.f32 %v2310_v33, %v2294_v53  ;;  %v2312_v49 = vpop.eup %2311 }
 0xc32   :  { %v1457_v32 = vpack.c.bf16 %v1449_v29, %v1449_v29  ;;  %v1450_v36 = vmul.f32 %v2312_v49, %v2962_v46  ;;  %v3013_v29 = vld [vmem:[%s3080_s10 + $0x8] sm:$0x3f] }
 0xc33   :  { %v1460_v35 = vpack.c.bf16 %v1452_v4, %v1452_v4 }
 0xc34   :  { %2096 = vmatmul.msk.bf16.vlgmr.msra.gmra.mxu0 %vm313_vm8, %v1457_v32  ;;  %v1458_v41 = vpack.c.bf16 %v1450_v36, %v1450_v36  ;;  %v1661_v32 = vperm.slane %v3013_v29, 0 }
 0xc39   :  { %v1589_v59 = vpop.permute.xlu0 %1588 }
 0xc3a   :  { %v1594_v34 = vsel %vm220_vm9, %v1589_v59, 0 }
 0xc3b   :  { %1603 = vmatpush.bf16.msra.mxu3 %v1594_v34 }
 0xc3e   :  { %2099 = vmatmul.msk.bf16.vlgmr.msra.gmra.mxu3 %vm313_vm8, %v1460_v35 }
 0xc40   :  { %v1547_v22 = vpop.permute.xlu1 %1546 }
 0xc41   :  { %v1552_v37 = vsel %vm220_vm9, %v1547_v22, 0  ;;  %v1610_v39 = vpop.permute.xlu0 %1609 }
 0xc42   :  { %v1615_v40 = vsel %vm220_vm9, %v1610_v39, 0  ;;  %1561 = vmatpush.bf16.msra.mxu1 %v1552_v37 }
 0xc43   :  { %1624 = vmatpush.bf16.msrb.mxu0 %v1615_v40 }
 0xc44   :  { %v1500_v60 = vpop.f32.mrf.mxu2 }
 0xc45   :  { %2097 = vmatmul.msk.bf16.vlgmr.msra.gmra.mxu1 %vm313_vm8, %v1458_v41 }
 0xc46   :  { %1683 = vmatpush.bf16.msrb.mxu1 %v2167_v7 }
 0xc4a   :  { %1684 = vmatpush.bf16.msrb.mxu1 %v2166_v11 }
 0xc4c   :  { %v1502_v42 = vpop.f32.mrf.mxu2 }
 0xc5c   :  { %v1431_v13 = vpop.xlane.xlu2 %1430 }
 0xc5d   :  { %v1479_v2 = vpop.f32.mrf.mxu1  ;;  %2313 = vrcp.f32 %v1431_v13 }
 0xc63   :  { %v2314_v43 = vpop.eup %2313 }
 0xc64   :  { %v1437_v54 = vpop.xlane.xlu2 %1436  ;;  %v1451_v6 = vmul.f32 %v2314_v43, %v2302_v21 }
 0xc65   :  { %2315 = vrcp.f32 %v1437_v54  ;;  %v1481_v61 = vpop.f32.mrf.mxu1 }
 0xc66   :  { %v1459_v52 = vpack.c.bf16 %v1451_v6, %v1451_v6  ;;  %v2168_v6 = vld [vmem:[%s3077_s7 + $0x10] sm:$0xff] }
 0xc6b   :  { %v2316_v44 = vpop.eup %2315 }
 0xc6c   :  { %v1453_v45 = vmul.f32 %v2316_v44, %v2304_v18  ;;  %v1568_v46 = vpop.permute.xlu2 %1567 }
 0xc6d   :  { %v1573_v47 = vsel %vm220_vm9, %v1568_v46, 0 }
 0xc6e   :  { %v1461_v51 = vpack.c.bf16 %v1453_v45, %v1453_v45  ;;  %1582 = vmatpush.bf16.msra.mxu2 %v1573_v47 }
 0xc70   :  { %2100 = vmatmul.msk.bf16.vlgmr.msrb.gmra.mxu0 %vm313_vm8, %v1461_v51 }
 0xc71   :  { %2098 = vmatmul.msk.bf16.vlgmr.msra.gmra.mxu2 %vm313_vm8, %v1459_v52 }
 0xca5   :  { %v1521_v53 = vpop.f32.mrf.mxu3 }
 0xcad   :  { %v1523_v55 = vpop.f32.mrf.mxu3 }
 0xcb1   :  { %v1542_v56 = vpop.f32.mrf.mxu0 }
 0xcb2   :  { %v2212_v57 = vpack.i.bf16 %v1542_v56, %v1521_v53 }
 0xcb4   :  { %2213 = vrot.lane.b32.xlu2 %v2212_v57, %s2515_s22 }
 0xcb9   :  { %v1544_v16 = vpop.f32.mrf.mxu0 }
 0xcc1   :  { %v1605_v27 = vpop.f32.mrf.mxu3 }
 0xcc2   :  { %v1563_v48 = vpop.f32.mrf.mxu1 }
 0xcc9   :  { %v1607_v58 = vpop.f32.mrf.mxu3 }
 0xcca   :  { %v1565_v62 = vpop.f32.mrf.mxu1 }
 0xced   :  { %v1626_v63 = vpop.f32.mrf.mxu0 }
 0xcee   :  { %v2222_v0 = vpack.i.bf16 %v1626_v63, %v1605_v27 }
 0xcf0   :  { %2223 = vrot.lane.b32.xlu0 %v2222_v0, %s2526_s1  ;;  %v1737_v0 = vperm.slane %v3013_v29, 2 }
 0xcf4   :  { %v1584_v1 = vpop.f32.mrf.mxu2 }
 0xcf5   :  { %v2217_v3 = vpack.i.bf16 %v1584_v1, %v1563_v48  ;;  %v1628_v5 = vpop.f32.mrf.mxu0 }
 0xcf7   :  { %2218 = vrot.lane.b32.xlu1 %v2217_v3, %s2511_s28 }
 0xcfc   :  { %v1586_v8 = vpop.f32.mrf.mxu2 }
 0xcfd   :  { %v1740_v8 = vperm.slane %v3013_v29, 3 }
 0xd0e   :  { %v2214_v9 = vpop.permute.xlu2 %2213 }
 0xd0f   :  { %v2216_v21 = vunpack.i.h.bf16 %v2214_v9  ;;  %v2215_v12 = vunpack.i.l.bf16 %v2214_v9 }
 0xd11   :  { %v1655_v17 = vsel %vm313_vm8, %v1500_v60, %v2216_v21  ;;  %v1654_v24 = vsel %vm313_vm8, %v1479_v2, %v2215_v12 }
 0xd62   :  { %v2224_v20 = vpop.permute.xlu0 %2223 }
 0xd63   :  { %v2226_v23 = vunpack.i.h.bf16 %v2224_v20  ;;  %v2225_v25 = vunpack.i.l.bf16 %v2224_v20 }
 0xd69   :  { %v2219_v18 = vpop.permute.xlu1 %2218 }
 0xd6a   :  { %v2221_v15 = vunpack.i.h.bf16 %v2219_v18  ;;  %v2220_v19 = vunpack.i.l.bf16 %v2219_v18  ;;  %v2173_v18 = vld [vmem:[%s3079_s9 + $0x38] sm:$0xff] }
 0xd6b   :  { %1827 = vmatpush.bf16.msrb.mxu3 %v2173_v18 }
 0xd6c   :  { %v1656_v14 = vsel %vm831_vm12, %v1654_v24, %v2220_v19  ;;  %v1657_v28 = vsel %vm831_vm12, %v1655_v17, %v2221_v15  ;;  %v2172_v15 = vld [vmem:[%s3079_s9 + $0x30] sm:$0xff]  ;;  %v2171_v19 = vld [vmem:[%s3079_s9 + $0x28] sm:$0xff] }
 0xd6d   :  { %v1658_v30 = vsel %vm834_vm13, %v1656_v14, %v2225_v25  ;;  %v1659_v31 = vsel %vm834_vm13, %v1657_v28, %v2226_v23  ;;  %v2232_v17 = vld [vmem:[#allocation8 + $0x1] ss:$0 sm:$0xff]  ;;  %v2170_v23 = vld [vmem:[%s3079_s9 + $0x20] sm:$0xff] }
 0xd6e   :  { %v1660_v26 = vpack.c.bf16 %v1659_v31, %v1658_v30 }
 0xd6f   :  { %1828 = vmatpush.bf16.msrb.mxu3 %v2172_v15 }
 0xd70   :  { %2109 = vmatmul.msk.bf16.vlgmr.msrb.gmra.mxu1 %vm146_vm0, %v1660_v26 }
 0xd73   :  { %1829 = vmatpush.bf16.msrb.mxu3 %v2171_v19 }
 0xd77   :  { %1830 = vmatpush.bf16.msrb.mxu3 %v2170_v23 }
 0xded   :  { %v1686_v33 = vpop.f32.mrf.mxu1 }
 0xdee   :  { %v1687_v4 = vadd.f32 %v1686_v33, %v1661_v32 }
 0xdf0   :  { %v1691_v59 = vadd.f32 %v1687_v4, %v2865_v50 }
 0xdf2   :  { %v1693_v34 = vsel %vm146_vm0, %v1691_v59, 0.0 }
 0xdf3   :  { %1694 = vadd.xlane.f32.xlu2 %v1693_v34 }
 0xdf5   :  { %v1688_v49 = vpop.f32.mrf.mxu1 }
 0xdf6   :  { %v1689_v35 = vadd.f32 %v1688_v49, %v1661_v32 }
 0xdf8   :  { %v1692_v36 = vadd.f32 %v1689_v35, %v2867_v38  ;;  %v2169_v38 = vld [vmem:[%s3077_s7 + $0x18] sm:$0xff] }
 0xdf9   :  { %1768 = vmatpush.bf16.msrb.mxu2 %v2169_v38 }
 0xdfa   :  { %v1696_v22 = vsel %vm146_vm0, %v1692_v36, 0.0 }
 0xdfb   :  { %1697 = vadd.xlane.f32.xlu1 %v1696_v22 }
 0xdfd   :  { %1769 = vmatpush.bf16.msrb.mxu2 %v2168_v6 }
 0xe66   :  { %v1695_v37 = vpop.xlane.xlu2 %1694 }
 0xe67   :  { %v1699_v39 = vmul.f32 %v1695_v37, %v2635_v10 }
 0xe69   :  { %v1701_v40 = vsub.f32 %v1691_v59, %v1699_v39 }
 0xe6b   :  { %v1703_v41 = vmul.f32 %v1701_v40, %v1701_v40 }
 0xe6d   :  { %v1705_v60 = vsel %vm146_vm0, %v1703_v41, 0.0 }
 0xe6e   :  { %v1698_v42 = vpop.xlane.xlu1 %1697  ;;  %1706 = vadd.xlane.f32.xlu0 %v1705_v60 }
 0xe6f   :  { %v1700_v50 = vmul.f32 %v1698_v42, %v2635_v10 }
 0xe71   :  { %v1702_v13 = vsub.f32 %v1692_v36, %v1700_v50 }
 0xe73   :  { %v1704_v2 = vmul.f32 %v1702_v13, %v1702_v13 }
 0xe75   :  { %v1708_v54 = vsel %vm146_vm0, %v1704_v2, 0.0 }
 0xe76   :  { %1709 = vadd.xlane.f32.xlu2 %v1708_v54 }
 0xee1   :  { %v1707_v61 = vpop.xlane.xlu0 %1706 }
 0xee2   :  { %v1711_v43 = vmul.f32 %v1707_v61, %v2635_v10 }
 0xee4   :  { %v1713_v44 = vadd.f32 1e-12, %v1711_v43 }
 0xee6   :  { %2317 = vrsqrt.f32 %v1713_v44  ;;  %vm1721_vm9 = vweird.f32 %v1713_v44 }
 0xee9   :  { %v1710_v45 = vpop.xlane.xlu2 %1709 }
 0xeea   :  { %v1712_v46 = vmul.f32 %v1710_v45, %v2635_v10 }
 0xeec   :  { %v2318_v47 = vpop.eup %2317  ;;  %v1714_v51 = vadd.f32 1e-12, %v1712_v46 }
 0xeed   :  { %v1716_v52 = vmul.f32 %v2318_v47, %v1713_v44  ;;  %vm1722_vm8 = vweird.f32 %v2318_v47 }
 0xeee   :  { %2319 = vrsqrt.f32 %v1714_v51  ;;  %vm1723_vm12 = vmor %vm1721_vm9, %vm1722_vm8  ;;  %vm1731_vm1 = vweird.f32 %v1714_v51 }
 0xeef   :  { %v1717_v53 = vmul.f32 %v2318_v47, %v1716_v52 }
 0xef1   :  { %v1718_v55 = vmul.f32 0.5, %v1717_v53 }
 0xef3   :  { %v1719_v56 = vsub.f32 1.5, %v1718_v55 }
 0xef4   :  { %v2320_v57 = vpop.eup %2319 }
 0xef5   :  { %v1720_v16 = vmul.f32 %v2318_v47, %v1719_v56  ;;  %v1726_v27 = vmul.f32 %v2320_v57, %v1714_v51  ;;  %vm1732_vm13 = vweird.f32 %v2320_v57 }
 0xef6   :  { %vm1733_vm2 = vmor %vm1731_vm1, %vm1732_vm13 }
 0xef7   :  { %v1727_v48 = vmul.f32 %v2320_v57, %v1726_v27  ;;  %v1724_v58 = vsel %vm1723_vm12, %v2318_v47, %v1720_v16 }
 0xef8   :  { %v1735_v1 = vmul.f32 %v1724_v58, %v1701_v40 }
 0xef9   :  { %v1728_v62 = vmul.f32 0.5, %v1727_v48 }
 0xefa   :  { %v1738_v7 = vmul.f32 %v1737_v0, %v1735_v1 }
 0xefb   :  { %v1729_v63 = vsub.f32 1.5, %v1728_v62 }
 0xefc   :  { %v1741_v21 = vadd.f32 %v1740_v8, %v1738_v7 }
 0xefd   :  { %v1730_v3 = vmul.f32 %v2320_v57, %v1729_v63  ;;  %v2175_v63 = vld [vmem:[#allocation10 + $0x8] sm:$0xff] }
 0xefe   :  { %1928 = vmatpush.bf16.msra.mxu0 %v2175_v63 }
 0xeff   :  { %v1734_v5 = vsel %vm1733_vm2, %v2320_v57, %v1730_v3  ;;  %v2174_v3 = vld [vmem:[#allocation10] sm:$0xff] }
 0xf00   :  { %v1736_v11 = vmul.f32 %v1734_v5, %v1702_v13  ;;  %v1795_v13 = vperm.slane %v3013_v29, 1 }
 0xf02   :  { %v1739_v9 = vmul.f32 %v1737_v0, %v1736_v11  ;;  %1929 = vmatpush.bf16.msra.mxu0 %v2174_v3 }
 0xf04   :  { %v1742_v12 = vadd.f32 %v1740_v8, %v1739_v9 }
 0xf06   :  { %v1743_v20 = vpack.c.bf16 %v1742_v12, %v1741_v21 }
 0xf08   :  { %2118 = vmatmul.msk.bf16.vlgmr.msrb.gmra.mxu2 %vm146_vm0, %v1743_v20 }
 0xf8b   :  { %v1771_v24 = vpop.f32.mrf.mxu2 }
 0xf8c   :  { %v1772_v25 = vadd.f32 %v2232_v17, %v1771_v24 }
 0xf8e   :  { %v1776_v14 = vmul.f32 %v1772_v25, %v1772_v25 }
 0xf90   :  { %v1778_v28 = vmul.f32 %v1776_v14, %v1772_v25  ;;  %v1886_v14 = vperm.slane %v3013_v29, 5 }
 0xf92   :  { %v1780_v30 = vmul.f32 0.044715, %v1778_v28 }
 0xf93   :  { %v1773_v31 = vpop.f32.mrf.mxu2 }
 0xf94   :  { %v1782_v26 = vadd.f32 %v1780_v30, %v1772_v25  ;;  %v1774_v32 = vadd.f32 %v2232_v17, %v1773_v31 }
 0xf96   :  { %v1784_v33 = vmul.f32 0.7978846, %v1782_v26  ;;  %v1777_v4 = vmul.f32 %v1774_v32, %v1774_v32 }
 0xf98   :  { %v1779_v59 = vmul.f32 %v1777_v4, %v1774_v32  ;;  %2321 = vtanh.f32 %v1784_v33 }
 0xf9a   :  { %v1781_v34 = vmul.f32 0.044715, %v1779_v59 }
 0xf9c   :  { %v1783_v49 = vadd.f32 %v1781_v34, %v1774_v32 }
 0xf9e   :  { %v1785_v35 = vmul.f32 0.7978846, %v1783_v49  ;;  %v2322_v36 = vpop.eup %2321 }
 0xf9f   :  { %v1788_v22 = vadd.f32 1.0, %v2322_v36 }
 0xfa0   :  { %2323 = vtanh.f32 %v1785_v35 }
 0xfa1   :  { %v1790_v39 = vmul.f32 0.5, %v1788_v22 }
 0xfa3   :  { %v1792_v60 = vmul.f32 %v1790_v39, %v1772_v25  ;;  %v2233_v39 = vld [vmem:[%s3082_s12] ss:$0 sm:$0xff] }
 0xfa6   :  { %v2324_v37 = vpop.eup %2323 }
 0xfa7   :  { %v1789_v40 = vadd.f32 1.0, %v2324_v37  ;;  %v2177_v37 = vld [vmem:[#allocation11 + $0x8] sm:$0xff] }
 0xfa8   :  { %1966 = vmatpush.bf16.msra.mxu1 %v2177_v37 }
 0xfa9   :  { %v1791_v41 = vmul.f32 0.5, %v1789_v40 }
 0xfab   :  { %v1793_v42 = vmul.f32 %v1791_v41, %v1774_v32 }
 0xfad   :  { %v1794_v50 = vpack.c.bf16 %v1793_v42, %v1792_v60 }
 0xfaf   :  { %2135 = vmatmul.msk.bf16.vlgmr.msrb.gmra.mxu3 %vm997_vm5, %v1794_v50 }
0x1032   :  { %v1832_v2 = vpop.f32.mrf.mxu3 }
0x1033   :  { %v1833_v54 = vadd.f32 %v1832_v2, %v1795_v13 }
0x1035   :  { %v1837_v38 = vadd.f32 %v1833_v54, %v1741_v21 }
0x1037   :  { %v1839_v61 = vsel %vm146_vm0, %v1837_v38, 0.0 }
0x1038   :  { %1840 = vadd.xlane.f32.xlu0 %v1839_v61 }
0x103a   :  { %v1834_v43 = vpop.f32.mrf.mxu3 }
0x103b   :  { %v1835_v44 = vadd.f32 %v1834_v43, %v1795_v13  ;;  %v2234_v13 = vld [vmem:[%s3084_s14] ss:$0 sm:$0xff] }
0x103d   :  { %v1838_v6 = vadd.f32 %v1835_v44, %v1742_v12 }
0x103f   :  { %v1842_v45 = vsel %vm146_vm0, %v1838_v6, 0.0 }
0x1040   :  { %1843 = vadd.xlane.f32.xlu1 %v1842_v45 }
0x10ab   :  { %v1841_v46 = vpop.xlane.xlu0 %1840 }
0x10ac   :  { %v1845_v47 = vmul.f32 %v1841_v46, %v2635_v10 }
0x10ae   :  { %v1847_v51 = vsub.f32 %v1837_v38, %v1845_v47 }
0x10b0   :  { %v1849_v52 = vmul.f32 %v1847_v51, %v1847_v51 }
0x10b2   :  { %v1851_v53 = vsel %vm146_vm0, %v1849_v52, 0.0 }
0x10b3   :  { %v1844_v55 = vpop.xlane.xlu1 %1843  ;;  %1852 = vadd.xlane.f32.xlu1 %v1851_v53 }
0x10b4   :  { %v1846_v56 = vmul.f32 %v1844_v55, %v2635_v10 }
0x10b6   :  { %v1848_v57 = vsub.f32 %v1838_v6, %v1846_v56 }
0x10b8   :  { %v1850_v16 = vmul.f32 %v1848_v57, %v1848_v57 }
0x10ba   :  { %v1854_v27 = vsel %vm146_vm0, %v1850_v16, 0.0 }
0x10bb   :  { %1855 = vadd.xlane.f32.xlu2 %v1854_v27 }
0x1126   :  { %v1853_v48 = vpop.xlane.xlu1 %1852 }
0x1127   :  { %v1857_v58 = vmul.f32 %v1853_v48, %v2635_v10 }
0x1129   :  { %v1859_v62 = vadd.f32 1e-12, %v1857_v58 }
0x112b   :  { %2325 = vrsqrt.f32 %v1859_v62  ;;  %vm1867_vm4 = vweird.f32 %v1859_v62 }
0x112e   :  { %v1856_v0 = vpop.xlane.xlu2 %1855 }
0x112f   :  { %v1858_v1 = vmul.f32 %v1856_v0, %v2635_v10  ;;  %v1883_v10 = vperm.slane %v3013_v29, 4  ;;  %v2176_v29 = vld [vmem:[#allocation11] sm:$0xff] }
0x1130   :  { %1967 = vmatpush.bf16.msra.mxu1 %v2176_v29 }
0x1131   :  { %v2326_v5 = vpop.eup %2325  ;;  %v1860_v8 = vadd.f32 1e-12, %v1858_v1 }
0x1132   :  { %v1862_v7 = vmul.f32 %v2326_v5, %v1859_v62  ;;  %vm1868_vm3 = vweird.f32 %v2326_v5 }
0x1133   :  { %2327 = vrsqrt.f32 %v1860_v8  ;;  %vm1869_vm5 = vmor %vm1867_vm4, %vm1868_vm3  ;;  %vm1877_vm7 = vweird.f32 %v1860_v8 }
0x1134   :  { %v1863_v11 = vmul.f32 %v2326_v5, %v1862_v7 }
0x1136   :  { %v1864_v9 = vmul.f32 0.5, %v1863_v11 }
0x1138   :  { %v1865_v21 = vsub.f32 1.5, %v1864_v9 }
0x1139   :  { %v2328_v12 = vpop.eup %2327 }
0x113a   :  { %v1866_v20 = vmul.f32 %v2326_v5, %v1865_v21  ;;  %v1872_v18 = vmul.f32 %v2328_v12, %v1860_v8  ;;  %vm1878_vm6 = vweird.f32 %v2328_v12 }
0x113b   :  { %vm1879_vm10 = vmor %vm1877_vm7, %vm1878_vm6 }
0x113c   :  { %v1870_v15 = vsel %vm1869_vm5, %v2326_v5, %v1866_v20  ;;  %v1873_v19 = vmul.f32 %v2328_v12, %v1872_v18 }
0x113d   :  { %v1881_v24 = vmul.f32 %v1870_v15, %v1847_v51 }
0x113e   :  { %v1874_v17 = vmul.f32 0.5, %v1873_v19 }
0x113f   :  { %v1884_v28 = vmul.f32 %v1883_v10, %v1881_v24 }
0x1140   :  { %v1875_v23 = vsub.f32 1.5, %v1874_v17 }
0x1141   :  { %v1887_v26 = vadd.f32 %v1886_v14, %v1884_v28 }
0x1142   :  { %v1876_v25 = vmul.f32 %v2328_v12, %v1875_v23 }
0x1143   :  { %v1893_v4 = vpack.c.bf16 %v1887_v26, %v1887_v26 }
0x1144   :  { %v1880_v30 = vsel %vm1879_vm10, %v2328_v12, %v1876_v25 }
0x1145   :  { %v1882_v31 = vmul.f32 %v1880_v30, %v1848_v57  ;;  %v1901_v49 = vunpack.c.l.b16 %v1893_v4 }
0x1147   :  { %v1885_v32 = vmul.f32 %v1883_v10, %v1882_v31 }
0x1149   :  { %v1888_v33 = vadd.f32 %v1886_v14, %v1885_v32 }
0x114b   :  { %v1894_v59 = vpack.c.bf16 %v1888_v33, %v1888_v33 }
0x114d   :  { %v1902_v34 = vunpack.c.l.b16 %v1894_v59 }
0x114f   :  { %v1903_v35 = vrot.slane %v1902_v34, 7 }
0x1151   :  { %v1905_v36 = vsel %vm1904_vm11, %v1903_v35, %v1901_v49 }
0x1152   :  { %v1906_v22 = vpack.c.b16 %v1905_v36, %v1905_v36 }
0x1154   :  { %2144 = vmatmul.msk.bf16.vlgmr.msra.gmra.mxu0 %vm146_vm0, %v1906_v22 }
0x11d1   :  { %v1931_v40 = vpop.f32.mrf.mxu0 }
0x11d2   :  { %v1932_v41 = vadd.f32 %v2233_v39, %v1931_v40 }
0x11d4   :  { %2329 = vtanh.f32 %v1932_v41 }
0x11d9   :  { %v1933_v60 = vpop.f32.mrf.mxu0 }
0x11da   :  { %v2330_v42 = vpop.eup %2329 }
0x11db   :  { %v1940_v50 = vpack.c.bf16 %v2330_v42, %v2330_v42 }
0x11dd   :  { %2153 = vmatmul.msk.bf16.vlgmr.msra.gmra.mxu1 %vm146_vm0, %v1940_v50 }
0x125a   :  { %v1969_v2 = vpop.f32.mrf.mxu1 }
0x125b   :  { %v1970_v54 = vadd.f32 %v2234_v13, %v1969_v2 }
0x125d   :  { %1973 = vst [vmem:[#allocation13] sm:$0x3] %v1970_v54 }
0x125e   :  { %1984 = dma.vmem_to_hbm [thread:$0]  %s1980_s18, 32, %s1982_s4, [#allocation4]  }
0x1262   :  { %v1971_v38 = vpop.f32.mrf.mxu1 }
0x1263   :  { %2507 = dma.done.wait [#allocation4], 32  }
0x1264   :  { %2508 = vsyncadd [#allocation4], 4294967264 }
0x1265   :  { %1989 = vsyncpa [#allocation3], 1 }
0x1266   :  { %1990 = vsyncpa [#allocation6], 1 }
0x1267   :  { %1991 = vsyncpa [#allocation9], 1 }
0x1268   :  { %1992 = vsyncpa [#allocation12], 1 }
0x1269   :  { %1993 = vsyncpa [#allocation4], 1 }

</bundles_post_ra>
